<compile_context>
chip_gen: v5e
topology: v5e:2x2
jax: 0.10.0
libtpu: 0.0.40
codegen_flags: <defaults>
</compile_context>

<pallas_src>
import math
from functools import partial

import jax
import jax.numpy as jnp
from jax import lax
from jax.experimental import pallas as pl
from jax.experimental.pallas import tpu as pltpu


def _attention_kernel(x_ref, wqkv_ref, wproj_ref, bproj_ref, o_ref,
                      qkv_ref, head_out_ref, *,
                      num_heads: int, head_dim: int,
                      n_valid: int, n_pad: int, block_b: int,
                      heads_per_group: int):
    # x_ref        : (block_b, n_pad, C)       bf16
    # wqkv_ref     : (C, 3C)                   bf16 (q columns pre-scaled)
    # wproj_ref    : (C, C)                    bf16
    # bproj_ref    : (1, C)                    f32
    # o_ref        : (block_b, n_pad, C)       out dtype
    # qkv_ref      : (block_b*n_pad, 3C)       bf16 VMEM scratch
    # head_out_ref : (block_b*n_pad, C)        bf16 VMEM scratch
    C = num_heads * head_dim
    M = block_b * n_pad

    # --- QKV projection, column-chunked: only (M, C) f32 live at a time ------
    x2d = x_ref[...].reshape(M, C)                                    # bf16
    for i in range(3):
        c0 = i * C
        part = jnp.dot(x2d, wqkv_ref[:, c0:c0 + C],
                       preferred_element_type=jnp.float32)            # (M, C) f32
        qkv_ref[:, c0:c0 + C] = part.astype(jnp.bfloat16)

    # Additive key mask for padded token columns (compile-time condition).
    if n_valid < n_pad:
        col = lax.broadcasted_iota(jnp.int32, (1, n_pad), 1)
        key_mask = jnp.where(col < n_valid, 0.0, -1e30).astype(jnp.float32)
    else:
        key_mask = None

    # --- per (batch-in-block, head) attention; stores grouped to 128 lanes ---
    for b in range(block_b):
        r0 = b * n_pad
        for g0 in range(0, num_heads, heads_per_group):
            o_parts = []
            for hh in range(heads_per_group):
                h = g0 + hh
                c0 = h * head_dim
                # bf16 reads straight from the VMEM scratch (q already scaled).
                q = qkv_ref[r0:r0 + n_pad, c0:c0 + head_dim]                  # (Np, d)
                k = qkv_ref[r0:r0 + n_pad, C + c0:C + c0 + head_dim]          # (Np, d)
                v = qkv_ref[r0:r0 + n_pad, 2 * C + c0:2 * C + c0 + head_dim]  # (Np, d)

                # s = q @ k^T (contract last dims; bf16 operands, f32 accum)
                s = lax.dot_general(q, k, (((1,), (1,)), ((), ())),
                                    preferred_element_type=jnp.float32)       # (Np, Np)
                if key_mask is not None:
                    s = s + key_mask

                # softmax in f32; normalize AFTER the PV matmul (fewer VPU mults)
                m = jnp.max(s, axis=-1, keepdims=True)
                p = jnp.exp(s - m)
                denom = jnp.sum(p, axis=-1, keepdims=True)
                o_h = jnp.dot(p.astype(jnp.bfloat16), v,
                              preferred_element_type=jnp.float32)             # (Np, d)
                o_h = o_h * pl.reciprocal(denom, approx=True)
                # attn_drop(p=0.0) -> identity
                o_parts.append(o_h.astype(jnp.bfloat16))

            gc0 = g0 * head_dim
            gw = heads_per_group * head_dim
            o_group = o_parts[0] if heads_per_group == 1 else \
                jnp.concatenate(o_parts, axis=-1)                             # (Np, gw)
            head_out_ref[r0:r0 + n_pad, gc0:gc0 + gw] = o_group

    # --- output projection: (M, C) x (C, C) bf16 matmul + f32 bias -----------
    y = jnp.dot(head_out_ref[...], wproj_ref[...],
                preferred_element_type=jnp.float32)                           # (M, C)
    y = y + bproj_ref[...]
    # proj_drop(p=0.0) -> identity
    o_ref[...] = y.reshape(block_b, n_pad, C).astype(o_ref.dtype)


def attention_pallas(x, w_qkv, w_proj, b_proj, *, num_heads: int,
                     block_b=None, out_dtype=None,
                     vmem_limit_bytes=48 * 1024 * 1024):
    B, N, C = x.shape
    head_dim = C // num_heads
    scale = head_dim ** (-0.5)
    out_dtype = x.dtype if out_dtype is None else out_dtype

    # bf16 vregs pack (16, 128): pad tokens to a multiple of 16.
    n_pad = ((N + 15) // 16) * 16

    # Prefer >= 2 grid steps (v7x has 2 TensorCores); bigger block_b only when
    # B still yields multiple steps.
    if block_b is None:
        block_b = 1
        for cand in (4, 3, 2):
            if B % cand == 0 and B // cand >= 2:
                block_b = cand
                break
    if block_b < 1 or B % block_b != 0:
        block_b = 1

    # Head grouping so head_out stores cover full 128-lane slabs when possible.
    if head_dim <= 128 and 128 % head_dim == 0:
        heads_per_group = math.gcd(num_heads, 128 // head_dim)
    else:
        heads_per_group = 1

    x_bf = x.astype(jnp.bfloat16)
    if n_pad != N:
        x_bf = jnp.pad(x_bf, ((0, 0), (0, n_pad - N), (0, 0)))

    # Fold the softmax scale into the q-columns of W_qkv (one-time weight op).
    w_qkv_f = jnp.asarray(w_qkv, jnp.float32)
    w_qkv_f = jnp.concatenate([w_qkv_f[:, :C] * scale, w_qkv_f[:, C:]], axis=1)
    w_qkv_bf = w_qkv_f.astype(jnp.bfloat16)
    w_proj_bf = jnp.asarray(w_proj, jnp.float32).astype(jnp.bfloat16)
    b_proj2d = jnp.asarray(b_proj, jnp.float32).reshape(1, C)

    kernel = partial(_attention_kernel, num_heads=num_heads, head_dim=head_dim,
                     n_valid=N, n_pad=n_pad, block_b=block_b,
                     heads_per_group=heads_per_group)

    def build(single_buffer_weights):
        # Weights/bias have constant index_maps -> resident in VMEM; request a
        # single buffer for them (double-buffering them only wastes VMEM).
        wkw = dict(pipeline_mode=pl.Buffered(1)) if single_buffer_weights else {}
        grid_spec = pltpu.PrefetchScalarGridSpec(
            num_scalar_prefetch=0,
            grid=(B // block_b,),
            in_specs=[
                pl.BlockSpec((block_b, n_pad, C), lambda b: (b, 0, 0)),      # x
                pl.BlockSpec((C, 3 * C), lambda b: (0, 0), **wkw),           # W_qkv
                pl.BlockSpec((C, C), lambda b: (0, 0), **wkw),               # W_proj
                pl.BlockSpec((1, C), lambda b: (0, 0), **wkw),               # b_proj
            ],
            out_specs=pl.BlockSpec((block_b, n_pad, C), lambda b: (b, 0, 0)),
            scratch_shapes=[
                pltpu.VMEM((block_b * n_pad, 3 * C), jnp.bfloat16),          # qkv
                pltpu.VMEM((block_b * n_pad, C), jnp.bfloat16),              # head_out
            ],
        )
        return pl.pallas_call(
            kernel,
            out_shape=jax.ShapeDtypeStruct((B, n_pad, C), out_dtype),
            grid_spec=grid_spec,
            compiler_params=pltpu.CompilerParams(
                dimension_semantics=("parallel",),
                vmem_limit_bytes=vmem_limit_bytes),
        )

    try:
        out = build(True)(x_bf, w_qkv_bf, w_proj_bf, b_proj2d)
        out = jax.block_until_ready(out)
    except Exception:
        # Fallback if single-buffered pipeline_mode is unsupported on this jax.
        out = build(False)(x_bf, w_qkv_bf, w_proj_bf, b_proj2d)
        out = jax.block_until_ready(out)

    if n_pad != N:
        out = out[:, :N, :]
    return out


def attention_reference(x, w_qkv, w_proj, b_proj, *, num_heads: int):
    """Pure-JAX f32 reference mirroring the PyTorch forward."""
    B, N, C = x.shape
    head_dim = C // num_heads
    scale = head_dim ** (-0.5)
    qkv = jnp.einsum('bnc,cd->bnd', x, w_qkv)                   # (B, N, 3C)
    qkv = qkv.reshape(B, N, 3, num_heads, head_dim).transpose(2, 0, 3, 1, 4)
    q, k, v = qkv[0], qkv[1], qkv[2]                            # (B, H, N, d)
    attn = jnp.einsum('bhqd,bhkd->bhqk', q, k) * scale
    attn = jax.nn.softmax(attn, axis=-1)
    out = jnp.einsum('bhqk,bhkd->bhqd', attn, v)
    out = out.transpose(0, 2, 1, 3).reshape(B, N, C)
    return jnp.einsum('bnc,cd->bnd', out, w_proj) + b_proj


if __name__ == "__main__":
    # Small ViT-ish shapes: N = 1 (CLS) + 4*4 patches = 17 (padded to 32 inside).
    B, H_sp, W_sp = 2, 4, 4
    N = 1 + H_sp * W_sp
    C = 32
    num_heads = 4

    key = jax.random.PRNGKey(0)
    kx, kq, kp, kb = jax.random.split(key, 4)
    x = jax.random.normal(kx, (B, N, C), dtype=jnp.float32)
    # qkv_bias=False (module default); proj has a bias like nn.Linear(dim, dim).
    w_qkv = jax.random.normal(kq, (C, 3 * C), dtype=jnp.float32) * 0.05
    w_proj = jax.random.normal(kp, (C, C), dtype=jnp.float32) * 0.05
    b_proj = jax.random.normal(kb, (C,), dtype=jnp.float32) * 0.05

    ref = attention_reference(x, w_qkv, w_proj, b_proj, num_heads=num_heads)

    # Exercise the auto block_b (grid of 2 steps) and the batched-step path.
    for bb in (None, 2):
        out = attention_pallas(x, w_qkv, w_proj, b_proj,
                               num_heads=num_heads, block_b=bb)
        out = jax.block_until_ready(out)
        assert out.shape == (B, N, C)
        max_err = jnp.max(jnp.abs(out - ref))
        # bf16 MXU operands -> loosened tolerance (accumulation/softmax stay f32).
        assert jnp.allclose(out, ref, atol=2e-2, rtol=2e-2), \
            f"block_b={bb} max err {max_err}"

    print("KERNEL_OK")
</pallas_src>

<mosaic_0001>
module attributes {stable_mosaic.version = 11 : i64} {
  func.func @_attention_kernel(%arg0: i32, %arg1: memref<1x32x32xbf16, #tpu.memory_space<vmem>>, %arg2: memref<32x96xbf16, #tpu.memory_space<vmem>>, %arg3: memref<32x32xbf16, #tpu.memory_space<vmem>>, %arg4: memref<1x32xf32, #tpu.memory_space<vmem>>, %arg5: memref<1x32x32xf32, #tpu.memory_space<vmem>>, %arg6: memref<32x96xbf16, #tpu.memory_space<vmem>>, %arg7: memref<32x32xbf16, #tpu.memory_space<vmem>>) attributes {dimension_semantics = [#tpu.dimension_semantics<parallel>], iteration_bounds = array<i64: 2>, scalar_prefetch = 0 : i64, scratch_operands = 2 : i64, tpu.core_type = #tpu.core_type<tc>, window_params = [{transform_indices = @transform_0, window_bounds = array<i64: 1, 32, 32>}, {pipeline_mode = #tpu.pipeline_mode<synchronous>, transform_indices = @transform_1, window_bounds = array<i64: 32, 96>}, {pipeline_mode = #tpu.pipeline_mode<synchronous>, transform_indices = @transform_2, window_bounds = array<i64: 32, 32>}, {pipeline_mode = #tpu.pipeline_mode<synchronous>, transform_indices = @transform_3, window_bounds = array<i64: 1, 32>}, {transform_indices = @transform_4, window_bounds = array<i64: 1, 32, 32>}]} {
    %c0 = arith.constant 0 : index
    %c0_0 = arith.constant 0 : index
    %c0_1 = arith.constant 0 : index
    %0 = vector.load %arg1[%c0, %c0_0, %c0_1] : memref<1x32x32xbf16, #tpu.memory_space<vmem>>, vector<1x32x32xbf16>
    %1 = vector.shape_cast %0 : vector<1x32x32xbf16> to vector<32x32xbf16>
    %c0_2 = arith.constant 0 : index
    %c0_3 = arith.constant 0 : index
    %2 = vector.load %arg2[%c0_2, %c0_3] : memref<32x96xbf16, #tpu.memory_space<vmem>>, vector<32x32xbf16>
    %cst = arith.constant dense<0.000000e+00> : vector<32x32xf32>
    %3 = tpu.matmul %1, %2, %cst {dimension_numbers = #tpu.dot_dimension_numbers<[1], [0], [0], [1], [0, 0, 1, 1], [], []>} : vector<32x32xbf16>, vector<32x32xbf16>, vector<32x32xf32> -> vector<32x32xf32>
    %4 = arith.truncf %3 : vector<32x32xf32> to vector<32x32xbf16>
    %c0_4 = arith.constant 0 : index
    %c0_5 = arith.constant 0 : index
    %5 = vector.load %arg6[%c0_4, %c0_5] : memref<32x96xbf16, #tpu.memory_space<vmem>>, vector<32x32xbf16>
    tpu.vector_store %arg6[%c0_4, %c0_5], %4 {strides = array<i32>} : memref<32x96xbf16, #tpu.memory_space<vmem>>, vector<32x32xbf16>,
    %c0_6 = arith.constant 0 : index
    %c32 = arith.constant 32 : index
    %6 = vector.load %arg2[%c0_6, %c32] : memref<32x96xbf16, #tpu.memory_space<vmem>>, vector<32x32xbf16>
    %cst_7 = arith.constant dense<0.000000e+00> : vector<32x32xf32>
    %7 = tpu.matmul %1, %6, %cst_7 {dimension_numbers = #tpu.dot_dimension_numbers<[1], [0], [0], [1], [0, 0, 1, 1], [], []>} : vector<32x32xbf16>, vector<32x32xbf16>, vector<32x32xf32> -> vector<32x32xf32>
    %8 = arith.truncf %7 : vector<32x32xf32> to vector<32x32xbf16>
    %c0_8 = arith.constant 0 : index
    %c32_9 = arith.constant 32 : index
    %9 = vector.load %arg6[%c0_8, %c32_9] : memref<32x96xbf16, #tpu.memory_space<vmem>>, vector<32x32xbf16>
    tpu.vector_store %arg6[%c0_8, %c32_9], %8 {strides = array<i32>} : memref<32x96xbf16, #tpu.memory_space<vmem>>, vector<32x32xbf16>,
    %c0_10 = arith.constant 0 : index
    %c64 = arith.constant 64 : index
    %10 = vector.load %arg2[%c0_10, %c64] : memref<32x96xbf16, #tpu.memory_space<vmem>>, vector<32x32xbf16>
    %cst_11 = arith.constant dense<0.000000e+00> : vector<32x32xf32>
    %11 = tpu.matmul %1, %10, %cst_11 {dimension_numbers = #tpu.dot_dimension_numbers<[1], [0], [0], [1], [0, 0, 1, 1], [], []>} : vector<32x32xbf16>, vector<32x32xbf16>, vector<32x32xf32> -> vector<32x32xf32>
    %12 = arith.truncf %11 : vector<32x32xf32> to vector<32x32xbf16>
    %c0_12 = arith.constant 0 : index
    %c64_13 = arith.constant 64 : index
    %13 = vector.load %arg6[%c0_12, %c64_13] : memref<32x96xbf16, #tpu.memory_space<vmem>>, vector<32x32xbf16>
    tpu.vector_store %arg6[%c0_12, %c64_13], %12 {strides = array<i32>} : memref<32x96xbf16, #tpu.memory_space<vmem>>, vector<32x32xbf16>,
    %14 = tpu.iota {dimensions = array<i32: 1>} : vector<1x32xi32>
    %c17_i32 = arith.constant 17 : i32
    %15 = vector.broadcast %c17_i32 : i32 to vector<1x32xi32>
    %16 = arith.cmpi slt, %14, %15 : vector<1x32xi32>
    %cst_14 = arith.constant 0.000000e+00 : f32
    %cst_15 = arith.constant -1.000000e+30 : f32
    %17 = vector.broadcast %cst_14 : f32 to vector<1x32xf32>
    %18 = vector.broadcast %cst_15 : f32 to vector<1x32xf32>
    %19 = arith.select %16, %17, %18 : vector<1x32xi1>, vector<1x32xf32>
    %c0_16 = arith.constant 0 : index
    %c0_17 = arith.constant 0 : index
    %20 = vector.load %arg6[%c0_16, %c0_17] : memref<32x96xbf16, #tpu.memory_space<vmem>>, vector<32x8xbf16>
    %c0_18 = arith.constant 0 : index
    %c32_19 = arith.constant 32 : index
    %21 = vector.load %arg6[%c0_18, %c32_19] : memref<32x96xbf16, #tpu.memory_space<vmem>>, vector<32x8xbf16>
    %c0_20 = arith.constant 0 : index
    %c64_21 = arith.constant 64 : index
    %22 = vector.load %arg6[%c0_20, %c64_21] : memref<32x96xbf16, #tpu.memory_space<vmem>>, vector<32x8xbf16>
    %cst_22 = arith.constant dense<0.000000e+00> : vector<32x32xf32>
    %23 = tpu.matmul %20, %21, %cst_22 {dimension_numbers = #tpu.dot_dimension_numbers<[1], [1], [0], [0], [0, 0, 1, 0], [], []>} : vector<32x8xbf16>, vector<32x8xbf16>, vector<32x32xf32> -> vector<32x32xf32>
    %24 = vector.broadcast %19 : vector<1x32xf32> to vector<32x32xf32>
    %25 = arith.addf %23, %24 : vector<32x32xf32>
    %cst_23 = arith.constant dense<0xFF800000> : vector<32xf32>
    %26 = vector.multi_reduction <maximumf>, %25, %cst_23 [1] : vector<32x32xf32> to vector<32xf32>
    %27 = vector.shape_cast %26 : vector<32xf32> to vector<32x1xf32>
    %28 = vector.broadcast %27 : vector<32x1xf32> to vector<32x32xf32>
    %29 = arith.subf %25, %28 : vector<32x32xf32>
    %30 = math.exp %29 : vector<32x32xf32>
    %cst_24 = arith.constant dense<0.000000e+00> : vector<32xf32>
    %31 = vector.multi_reduction <add>, %30, %cst_24 [1] : vector<32x32xf32> to vector<32xf32>
    %32 = vector.shape_cast %31 : vector<32xf32> to vector<32x1xf32>
    %33 = arith.truncf %30 : vector<32x32xf32> to vector<32x32xbf16>
    %cst_25 = arith.constant dense<0.000000e+00> : vector<32x8xf32>
    %34 = tpu.matmul %33, %22, %cst_25 {dimension_numbers = #tpu.dot_dimension_numbers<[1], [0], [0], [1], [0, 0, 1, 1], [], []>} : vector<32x32xbf16>, vector<32x8xbf16>, vector<32x8xf32> -> vector<32x8xf32>
    %35 = tpu.reciprocal %32 {approx = true} : vector<32x1xf32> -> vector<32x1xf32>
    %36 = vector.broadcast %35 : vector<32x1xf32> to vector<32x8xf32>
    %37 = arith.mulf %34, %36 : vector<32x8xf32>
    %38 = arith.truncf %37 : vector<32x8xf32> to vector<32x8xbf16>
    %c0_26 = arith.constant 0 : index
    %c8 = arith.constant 8 : index
    %39 = vector.load %arg6[%c0_26, %c8] : memref<32x96xbf16, #tpu.memory_space<vmem>>, vector<32x8xbf16>
    %c0_27 = arith.constant 0 : index
    %c40 = arith.constant 40 : index
    %40 = vector.load %arg6[%c0_27, %c40] : memref<32x96xbf16, #tpu.memory_space<vmem>>, vector<32x8xbf16>
    %c0_28 = arith.constant 0 : index
    %c72 = arith.constant 72 : index
    %41 = vector.load %arg6[%c0_28, %c72] : memref<32x96xbf16, #tpu.memory_space<vmem>>, vector<32x8xbf16>
    %cst_29 = arith.constant dense<0.000000e+00> : vector<32x32xf32>
    %42 = tpu.matmul %39, %40, %cst_29 {dimension_numbers = #tpu.dot_dimension_numbers<[1], [1], [0], [0], [0, 0, 1, 0], [], []>} : vector<32x8xbf16>, vector<32x8xbf16>, vector<32x32xf32> -> vector<32x32xf32>
    %43 = vector.broadcast %19 : vector<1x32xf32> to vector<32x32xf32>
    %44 = arith.addf %42, %43 : vector<32x32xf32>
    %cst_30 = arith.constant dense<0xFF800000> : vector<32xf32>
    %45 = vector.multi_reduction <maximumf>, %44, %cst_30 [1] : vector<32x32xf32> to vector<32xf32>
    %46 = vector.shape_cast %45 : vector<32xf32> to vector<32x1xf32>
    %47 = vector.broadcast %46 : vector<32x1xf32> to vector<32x32xf32>
    %48 = arith.subf %44, %47 : vector<32x32xf32>
    %49 = math.exp %48 : vector<32x32xf32>
    %cst_31 = arith.constant dense<0.000000e+00> : vector<32xf32>
    %50 = vector.multi_reduction <add>, %49, %cst_31 [1] : vector<32x32xf32> to vector<32xf32>
    %51 = vector.shape_cast %50 : vector<32xf32> to vector<32x1xf32>
    %52 = arith.truncf %49 : vector<32x32xf32> to vector<32x32xbf16>
    %cst_32 = arith.constant dense<0.000000e+00> : vector<32x8xf32>
    %53 = tpu.matmul %52, %41, %cst_32 {dimension_numbers = #tpu.dot_dimension_numbers<[1], [0], [0], [1], [0, 0, 1, 1], [], []>} : vector<32x32xbf16>, vector<32x8xbf16>, vector<32x8xf32> -> vector<32x8xf32>
    %54 = tpu.reciprocal %51 {approx = true} : vector<32x1xf32> -> vector<32x1xf32>
    %55 = vector.broadcast %54 : vector<32x1xf32> to vector<32x8xf32>
    %56 = arith.mulf %53, %55 : vector<32x8xf32>
    %57 = arith.truncf %56 : vector<32x8xf32> to vector<32x8xbf16>
    %c0_33 = arith.constant 0 : index
    %c16 = arith.constant 16 : index
    %58 = vector.load %arg6[%c0_33, %c16] : memref<32x96xbf16, #tpu.memory_space<vmem>>, vector<32x8xbf16>
    %c0_34 = arith.constant 0 : index
    %c48 = arith.constant 48 : index
    %59 = vector.load %arg6[%c0_34, %c48] : memref<32x96xbf16, #tpu.memory_space<vmem>>, vector<32x8xbf16>
    %c0_35 = arith.constant 0 : index
    %c80 = arith.constant 80 : index
    %60 = vector.load %arg6[%c0_35, %c80] : memref<32x96xbf16, #tpu.memory_space<vmem>>, vector<32x8xbf16>
    %cst_36 = arith.constant dense<0.000000e+00> : vector<32x32xf32>
    %61 = tpu.matmul %58, %59, %cst_36 {dimension_numbers = #tpu.dot_dimension_numbers<[1], [1], [0], [0], [0, 0, 1, 0], [], []>} : vector<32x8xbf16>, vector<32x8xbf16>, vector<32x32xf32> -> vector<32x32xf32>
    %62 = vector.broadcast %19 : vector<1x32xf32> to vector<32x32xf32>
    %63 = arith.addf %61, %62 : vector<32x32xf32>
    %cst_37 = arith.constant dense<0xFF800000> : vector<32xf32>
    %64 = vector.multi_reduction <maximumf>, %63, %cst_37 [1] : vector<32x32xf32> to vector<32xf32>
    %65 = vector.shape_cast %64 : vector<32xf32> to vector<32x1xf32>
    %66 = vector.broadcast %65 : vector<32x1xf32> to vector<32x32xf32>
    %67 = arith.subf %63, %66 : vector<32x32xf32>
    %68 = math.exp %67 : vector<32x32xf32>
    %cst_38 = arith.constant dense<0.000000e+00> : vector<32xf32>
    %69 = vector.multi_reduction <add>, %68, %cst_38 [1] : vector<32x32xf32> to vector<32xf32>
    %70 = vector.shape_cast %69 : vector<32xf32> to vector<32x1xf32>
    %71 = arith.truncf %68 : vector<32x32xf32> to vector<32x32xbf16>
    %cst_39 = arith.constant dense<0.000000e+00> : vector<32x8xf32>
    %72 = tpu.matmul %71, %60, %cst_39 {dimension_numbers = #tpu.dot_dimension_numbers<[1], [0], [0], [1], [0, 0, 1, 1], [], []>} : vector<32x32xbf16>, vector<32x8xbf16>, vector<32x8xf32> -> vector<32x8xf32>
    %73 = tpu.reciprocal %70 {approx = true} : vector<32x1xf32> -> vector<32x1xf32>
    %74 = vector.broadcast %73 : vector<32x1xf32> to vector<32x8xf32>
    %75 = arith.mulf %72, %74 : vector<32x8xf32>
    %76 = arith.truncf %75 : vector<32x8xf32> to vector<32x8xbf16>
    %c0_40 = arith.constant 0 : index
    %c24 = arith.constant 24 : index
    %77 = vector.load %arg6[%c0_40, %c24] : memref<32x96xbf16, #tpu.memory_space<vmem>>, vector<32x8xbf16>
    %c0_41 = arith.constant 0 : index
    %c56 = arith.constant 56 : index
    %78 = vector.load %arg6[%c0_41, %c56] : memref<32x96xbf16, #tpu.memory_space<vmem>>, vector<32x8xbf16>
    %c0_42 = arith.constant 0 : index
    %c88 = arith.constant 88 : index
    %79 = vector.load %arg6[%c0_42, %c88] : memref<32x96xbf16, #tpu.memory_space<vmem>>, vector<32x8xbf16>
    %cst_43 = arith.constant dense<0.000000e+00> : vector<32x32xf32>
    %80 = tpu.matmul %77, %78, %cst_43 {dimension_numbers = #tpu.dot_dimension_numbers<[1], [1], [0], [0], [0, 0, 1, 0], [], []>} : vector<32x8xbf16>, vector<32x8xbf16>, vector<32x32xf32> -> vector<32x32xf32>
    %81 = vector.broadcast %19 : vector<1x32xf32> to vector<32x32xf32>
    %82 = arith.addf %80, %81 : vector<32x32xf32>
    %cst_44 = arith.constant dense<0xFF800000> : vector<32xf32>
    %83 = vector.multi_reduction <maximumf>, %82, %cst_44 [1] : vector<32x32xf32> to vector<32xf32>
    %84 = vector.shape_cast %83 : vector<32xf32> to vector<32x1xf32>
    %85 = vector.broadcast %84 : vector<32x1xf32> to vector<32x32xf32>
    %86 = arith.subf %82, %85 : vector<32x32xf32>
    %87 = math.exp %86 : vector<32x32xf32>
    %cst_45 = arith.constant dense<0.000000e+00> : vector<32xf32>
    %88 = vector.multi_reduction <add>, %87, %cst_45 [1] : vector<32x32xf32> to vector<32xf32>
    %89 = vector.shape_cast %88 : vector<32xf32> to vector<32x1xf32>
    %90 = arith.truncf %87 : vector<32x32xf32> to vector<32x32xbf16>
    %cst_46 = arith.constant dense<0.000000e+00> : vector<32x8xf32>
    %91 = tpu.matmul %90, %79, %cst_46 {dimension_numbers = #tpu.dot_dimension_numbers<[1], [0], [0], [1], [0, 0, 1, 1], [], []>} : vector<32x32xbf16>, vector<32x8xbf16>, vector<32x8xf32> -> vector<32x8xf32>
    %92 = tpu.reciprocal %89 {approx = true} : vector<32x1xf32> -> vector<32x1xf32>
    %93 = vector.broadcast %92 : vector<32x1xf32> to vector<32x8xf32>
    %94 = arith.mulf %91, %93 : vector<32x8xf32>
    %95 = arith.truncf %94 : vector<32x8xf32> to vector<32x8xbf16>
    %96 = tpu.concatenate %38, %57, %76, %95 in 1 : vector<32x8xbf16>, vector<32x8xbf16>, vector<32x8xbf16>, vector<32x8xbf16> -> vector<32x32xbf16>
    %c0_47 = arith.constant 0 : index
    %c0_48 = arith.constant 0 : index
    %97 = vector.load %arg7[%c0_47, %c0_48] : memref<32x32xbf16, #tpu.memory_space<vmem>>, vector<32x32xbf16>
    tpu.vector_store %arg7[%c0_47, %c0_48], %96 {strides = array<i32>} : memref<32x32xbf16, #tpu.memory_space<vmem>>, vector<32x32xbf16>,
    %c0_49 = arith.constant 0 : index
    %c0_50 = arith.constant 0 : index
    %98 = vector.load %arg7[%c0_49, %c0_50] : memref<32x32xbf16, #tpu.memory_space<vmem>>, vector<32x32xbf16>
    %c0_51 = arith.constant 0 : index
    %c0_52 = arith.constant 0 : index
    %99 = vector.load %arg3[%c0_51, %c0_52] : memref<32x32xbf16, #tpu.memory_space<vmem>>, vector<32x32xbf16>
    %cst_53 = arith.constant dense<0.000000e+00> : vector<32x32xf32>
    %100 = tpu.matmul %98, %99, %cst_53 {dimension_numbers = #tpu.dot_dimension_numbers<[1], [0], [0], [1], [0, 0, 1, 1], [], []>} : vector<32x32xbf16>, vector<32x32xbf16>, vector<32x32xf32> -> vector<32x32xf32>
    %c0_54 = arith.constant 0 : index
    %c0_55 = arith.constant 0 : index
    %101 = vector.load %arg4[%c0_54, %c0_55] : memref<1x32xf32, #tpu.memory_space<vmem>>, vector<1x32xf32>
    %102 = vector.broadcast %101 : vector<1x32xf32> to vector<32x32xf32>
    %103 = arith.addf %100, %102 : vector<32x32xf32>
    %104 = vector.shape_cast %103 : vector<32x32xf32> to vector<1x32x32xf32>
    %c0_56 = arith.constant 0 : index
    %c0_57 = arith.constant 0 : index
    %c0_58 = arith.constant 0 : index
    %105 = vector.load %arg5[%c0_56, %c0_57, %c0_58] : memref<1x32x32xf32, #tpu.memory_space<vmem>>, vector<1x32x32xf32>
    tpu.vector_store %arg5[%c0_56, %c0_57, %c0_58], %104 {strides = array<i32>} : memref<1x32x32xf32, #tpu.memory_space<vmem>>, vector<1x32x32xf32>,
    return
  }
  func.func @transform_0(%arg0: i32) -> (i32, i32, i32) {
    %c0_i32 = arith.constant 0 : i32
    %c0_i32_0 = arith.constant 0 : i32
    %c0_i32_1 = arith.constant 0 : i32
    return %arg0, %c0_i32, %c0_i32_0 : i32, i32, i32
  }
  func.func @transform_1(%arg0: i32) -> (i32, i32) {
    %c0_i32 = arith.constant 0 : i32
    %c0_i32_0 = arith.constant 0 : i32
    %c0_i32_1 = arith.constant 0 : i32
    return %c0_i32, %c0_i32_0 : i32, i32
  }
  func.func @transform_2(%arg0: i32) -> (i32, i32) {
    %c0_i32 = arith.constant 0 : i32
    %c0_i32_0 = arith.constant 0 : i32
    %c0_i32_1 = arith.constant 0 : i32
    return %c0_i32, %c0_i32_0 : i32, i32
  }
  func.func @transform_3(%arg0: i32) -> (i32, i32) {
    %c0_i32 = arith.constant 0 : i32
    %c0_i32_0 = arith.constant 0 : i32
    %c0_i32_1 = arith.constant 0 : i32
    return %c0_i32, %c0_i32_0 : i32, i32
  }
  func.func @transform_4(%arg0: i32) -> (i32, i32, i32) {
    %c0_i32 = arith.constant 0 : i32
    %c0_i32_0 = arith.constant 0 : i32
    %c0_i32_1 = arith.constant 0 : i32
    return %arg0, %c0_i32, %c0_i32_0 : i32, i32, i32
  }
}

module attributes {stable_mosaic.version = 11 : i64} {
  func.func @_attention_kernel(%arg0: i32, %arg1: memref<1x32x32xbf16, #tpu.memory_space<vmem>>, %arg2: memref<32x96xbf16, #tpu.memory_space<vmem>>, %arg3: memref<32x32xbf16, #tpu.memory_space<vmem>>, %arg4: memref<1x32xf32, #tpu.memory_space<vmem>>, %arg5: memref<1x32x32xf32, #tpu.memory_space<vmem>>, %arg6: memref<32x96xbf16, #tpu.memory_space<vmem>>, %arg7: memref<32x32xbf16, #tpu.memory_space<vmem>>) attributes {dimension_semantics = [#tpu.dimension_semantics<parallel>], iteration_bounds = array<i64: 2>, scalar_prefetch = 0 : i64, scratch_operands = 2 : i64, tpu.core_type = #tpu.core_type<tc>, window_params = [{transform_indices = @transform_0, window_bounds = array<i64: 1, 32, 32>}, {pipeline_mode = #tpu.pipeline_mode<synchronous>, transform_indices = @transform_1, window_bounds = array<i64: 32, 96>}, {pipeline_mode = #tpu.pipeline_mode<synchronous>, transform_indices = @transform_2, window_bounds = array<i64: 32, 32>}, {pipeline_mode = #tpu.pipeline_mode<synchronous>, transform_indices = @transform_3, window_bounds = array<i64: 1, 32>}, {transform_indices = @transform_4, window_bounds = array<i64: 1, 32, 32>}]} {
    %c0 = arith.constant 0 : index
    %c0_0 = arith.constant 0 : index
    %c0_1 = arith.constant 0 : index
    %0 = vector.load %arg1[%c0, %c0_0, %c0_1] : memref<1x32x32xbf16, #tpu.memory_space<vmem>>, vector<1x32x32xbf16>
    %1 = vector.shape_cast %0 : vector<1x32x32xbf16> to vector<32x32xbf16>
    %c0_2 = arith.constant 0 : index
    %c0_3 = arith.constant 0 : index
    %2 = vector.load %arg2[%c0_2, %c0_3] : memref<32x96xbf16, #tpu.memory_space<vmem>>, vector<32x32xbf16>
    %cst = arith.constant dense<0.000000e+00> : vector<32x32xf32>
    %3 = tpu.matmul %1, %2, %cst {dimension_numbers = #tpu.dot_dimension_numbers<[1], [0], [0], [1], [0, 0, 1, 1], [], []>} : vector<32x32xbf16>, vector<32x32xbf16>, vector<32x32xf32> -> vector<32x32xf32>
    %4 = arith.truncf %3 : vector<32x32xf32> to vector<32x32xbf16>
    %c0_4 = arith.constant 0 : index
    %c0_5 = arith.constant 0 : index
    %5 = vector.load %arg6[%c0_4, %c0_5] : memref<32x96xbf16, #tpu.memory_space<vmem>>, vector<32x32xbf16>
    tpu.vector_store %arg6[%c0_4, %c0_5], %4 {strides = array<i32>} : memref<32x96xbf16, #tpu.memory_space<vmem>>, vector<32x32xbf16>,
    %c0_6 = arith.constant 0 : index
    %c32 = arith.constant 32 : index
    %6 = vector.load %arg2[%c0_6, %c32] : memref<32x96xbf16, #tpu.memory_space<vmem>>, vector<32x32xbf16>
    %cst_7 = arith.constant dense<0.000000e+00> : vector<32x32xf32>
    %7 = tpu.matmul %1, %6, %cst_7 {dimension_numbers = #tpu.dot_dimension_numbers<[1], [0], [0], [1], [0, 0, 1, 1], [], []>} : vector<32x32xbf16>, vector<32x32xbf16>, vector<32x32xf32> -> vector<32x32xf32>
    %8 = arith.truncf %7 : vector<32x32xf32> to vector<32x32xbf16>
    %c0_8 = arith.constant 0 : index
    %c32_9 = arith.constant 32 : index
    %9 = vector.load %arg6[%c0_8, %c32_9] : memref<32x96xbf16, #tpu.memory_space<vmem>>, vector<32x32xbf16>
    tpu.vector_store %arg6[%c0_8, %c32_9], %8 {strides = array<i32>} : memref<32x96xbf16, #tpu.memory_space<vmem>>, vector<32x32xbf16>,
    %c0_10 = arith.constant 0 : index
    %c64 = arith.constant 64 : index
    %10 = vector.load %arg2[%c0_10, %c64] : memref<32x96xbf16, #tpu.memory_space<vmem>>, vector<32x32xbf16>
    %cst_11 = arith.constant dense<0.000000e+00> : vector<32x32xf32>
    %11 = tpu.matmul %1, %10, %cst_11 {dimension_numbers = #tpu.dot_dimension_numbers<[1], [0], [0], [1], [0, 0, 1, 1], [], []>} : vector<32x32xbf16>, vector<32x32xbf16>, vector<32x32xf32> -> vector<32x32xf32>
    %12 = arith.truncf %11 : vector<32x32xf32> to vector<32x32xbf16>
    %c0_12 = arith.constant 0 : index
    %c64_13 = arith.constant 64 : index
    %13 = vector.load %arg6[%c0_12, %c64_13] : memref<32x96xbf16, #tpu.memory_space<vmem>>, vector<32x32xbf16>
    tpu.vector_store %arg6[%c0_12, %c64_13], %12 {strides = array<i32>} : memref<32x96xbf16, #tpu.memory_space<vmem>>, vector<32x32xbf16>,
    %14 = tpu.iota {dimensions = array<i32: 1>} : vector<1x32xi32>
    %c17_i32 = arith.constant 17 : i32
    %15 = vector.broadcast %c17_i32 : i32 to vector<1x32xi32>
    %16 = arith.cmpi slt, %14, %15 : vector<1x32xi32>
    %cst_14 = arith.constant 0.000000e+00 : f32
    %cst_15 = arith.constant -1.000000e+30 : f32
    %17 = vector.broadcast %cst_14 : f32 to vector<1x32xf32>
    %18 = vector.broadcast %cst_15 : f32 to vector<1x32xf32>
    %19 = arith.select %16, %17, %18 : vector<1x32xi1>, vector<1x32xf32>
    %c0_16 = arith.constant 0 : index
    %c0_17 = arith.constant 0 : index
    %20 = vector.load %arg6[%c0_16, %c0_17] : memref<32x96xbf16, #tpu.memory_space<vmem>>, vector<32x8xbf16>
    %c0_18 = arith.constant 0 : index
    %c32_19 = arith.constant 32 : index
    %21 = vector.load %arg6[%c0_18, %c32_19] : memref<32x96xbf16, #tpu.memory_space<vmem>>, vector<32x8xbf16>
    %c0_20 = arith.constant 0 : index
    %c64_21 = arith.constant 64 : index
    %22 = vector.load %arg6[%c0_20, %c64_21] : memref<32x96xbf16, #tpu.memory_space<vmem>>, vector<32x8xbf16>
    %cst_22 = arith.constant dense<0.000000e+00> : vector<32x32xf32>
    %23 = tpu.matmul %20, %21, %cst_22 {dimension_numbers = #tpu.dot_dimension_numbers<[1], [1], [0], [0], [0, 0, 1, 0], [], []>} : vector<32x8xbf16>, vector<32x8xbf16>, vector<32x32xf32> -> vector<32x32xf32>
    %24 = vector.broadcast %19 : vector<1x32xf32> to vector<32x32xf32>
    %25 = arith.addf %23, %24 : vector<32x32xf32>
    %cst_23 = arith.constant dense<0xFF800000> : vector<32xf32>
    %26 = vector.multi_reduction <maximumf>, %25, %cst_23 [1] : vector<32x32xf32> to vector<32xf32>
    %27 = vector.shape_cast %26 : vector<32xf32> to vector<32x1xf32>
    %28 = vector.broadcast %27 : vector<32x1xf32> to vector<32x32xf32>
    %29 = arith.subf %25, %28 : vector<32x32xf32>
    %30 = math.exp %29 : vector<32x32xf32>
    %cst_24 = arith.constant dense<0.000000e+00> : vector<32xf32>
    %31 = vector.multi_reduction <add>, %30, %cst_24 [1] : vector<32x32xf32> to vector<32xf32>
    %32 = vector.shape_cast %31 : vector<32xf32> to vector<32x1xf32>
    %33 = arith.truncf %30 : vector<32x32xf32> to vector<32x32xbf16>
    %cst_25 = arith.constant dense<0.000000e+00> : vector<32x8xf32>
    %34 = tpu.matmul %33, %22, %cst_25 {dimension_numbers = #tpu.dot_dimension_numbers<[1], [0], [0], [1], [0, 0, 1, 1], [], []>} : vector<32x32xbf16>, vector<32x8xbf16>, vector<32x8xf32> -> vector<32x8xf32>
    %35 = tpu.reciprocal %32 {approx = true} : vector<32x1xf32> -> vector<32x1xf32>
    %36 = vector.broadcast %35 : vector<32x1xf32> to vector<32x8xf32>
    %37 = arith.mulf %34, %36 : vector<32x8xf32>
    %38 = arith.truncf %37 : vector<32x8xf32> to vector<32x8xbf16>
    %c0_26 = arith.constant 0 : index
    %c8 = arith.constant 8 : index
    %39 = vector.load %arg6[%c0_26, %c8] : memref<32x96xbf16, #tpu.memory_space<vmem>>, vector<32x8xbf16>
    %c0_27 = arith.constant 0 : index
    %c40 = arith.constant 40 : index
    %40 = vector.load %arg6[%c0_27, %c40] : memref<32x96xbf16, #tpu.memory_space<vmem>>, vector<32x8xbf16>
    %c0_28 = arith.constant 0 : index
    %c72 = arith.constant 72 : index
    %41 = vector.load %arg6[%c0_28, %c72] : memref<32x96xbf16, #tpu.memory_space<vmem>>, vector<32x8xbf16>
    %cst_29 = arith.constant dense<0.000000e+00> : vector<32x32xf32>
    %42 = tpu.matmul %39, %40, %cst_29 {dimension_numbers = #tpu.dot_dimension_numbers<[1], [1], [0], [0], [0, 0, 1, 0], [], []>} : vector<32x8xbf16>, vector<32x8xbf16>, vector<32x32xf32> -> vector<32x32xf32>
    %43 = vector.broadcast %19 : vector<1x32xf32> to vector<32x32xf32>
    %44 = arith.addf %42, %43 : vector<32x32xf32>
    %cst_30 = arith.constant dense<0xFF800000> : vector<32xf32>
    %45 = vector.multi_reduction <maximumf>, %44, %cst_30 [1] : vector<32x32xf32> to vector<32xf32>
    %46 = vector.shape_cast %45 : vector<32xf32> to vector<32x1xf32>
    %47 = vector.broadcast %46 : vector<32x1xf32> to vector<32x32xf32>
    %48 = arith.subf %44, %47 : vector<32x32xf32>
    %49 = math.exp %48 : vector<32x32xf32>
    %cst_31 = arith.constant dense<0.000000e+00> : vector<32xf32>
    %50 = vector.multi_reduction <add>, %49, %cst_31 [1] : vector<32x32xf32> to vector<32xf32>
    %51 = vector.shape_cast %50 : vector<32xf32> to vector<32x1xf32>
    %52 = arith.truncf %49 : vector<32x32xf32> to vector<32x32xbf16>
    %cst_32 = arith.constant dense<0.000000e+00> : vector<32x8xf32>
    %53 = tpu.matmul %52, %41, %cst_32 {dimension_numbers = #tpu.dot_dimension_numbers<[1], [0], [0], [1], [0, 0, 1, 1], [], []>} : vector<32x32xbf16>, vector<32x8xbf16>, vector<32x8xf32> -> vector<32x8xf32>
    %54 = tpu.reciprocal %51 {approx = true} : vector<32x1xf32> -> vector<32x1xf32>
    %55 = vector.broadcast %54 : vector<32x1xf32> to vector<32x8xf32>
    %56 = arith.mulf %53, %55 : vector<32x8xf32>
    %57 = arith.truncf %56 : vector<32x8xf32> to vector<32x8xbf16>
    %c0_33 = arith.constant 0 : index
    %c16 = arith.constant 16 : index
    %58 = vector.load %arg6[%c0_33, %c16] : memref<32x96xbf16, #tpu.memory_space<vmem>>, vector<32x8xbf16>
    %c0_34 = arith.constant 0 : index
    %c48 = arith.constant 48 : index
    %59 = vector.load %arg6[%c0_34, %c48] : memref<32x96xbf16, #tpu.memory_space<vmem>>, vector<32x8xbf16>
    %c0_35 = arith.constant 0 : index
    %c80 = arith.constant 80 : index
    %60 = vector.load %arg6[%c0_35, %c80] : memref<32x96xbf16, #tpu.memory_space<vmem>>, vector<32x8xbf16>
    %cst_36 = arith.constant dense<0.000000e+00> : vector<32x32xf32>
    %61 = tpu.matmul %58, %59, %cst_36 {dimension_numbers = #tpu.dot_dimension_numbers<[1], [1], [0], [0], [0, 0, 1, 0], [], []>} : vector<32x8xbf16>, vector<32x8xbf16>, vector<32x32xf32> -> vector<32x32xf32>
    %62 = vector.broadcast %19 : vector<1x32xf32> to vector<32x32xf32>
    %63 = arith.addf %61, %62 : vector<32x32xf32>
    %cst_37 = arith.constant dense<0xFF800000> : vector<32xf32>
    %64 = vector.multi_reduction <maximumf>, %63, %cst_37 [1] : vector<32x32xf32> to vector<32xf32>
    %65 = vector.shape_cast %64 : vector<32xf32> to vector<32x1xf32>
    %66 = vector.broadcast %65 : vector<32x1xf32> to vector<32x32xf32>
    %67 = arith.subf %63, %66 : vector<32x32xf32>
    %68 = math.exp %67 : vector<32x32xf32>
    %cst_38 = arith.constant dense<0.000000e+00> : vector<32xf32>
    %69 = vector.multi_reduction <add>, %68, %cst_38 [1] : vector<32x32xf32> to vector<32xf32>
    %70 = vector.shape_cast %69 : vector<32xf32> to vector<32x1xf32>
    %71 = arith.truncf %68 : vector<32x32xf32> to vector<32x32xbf16>
    %cst_39 = arith.constant dense<0.000000e+00> : vector<32x8xf32>
    %72 = tpu.matmul %71, %60, %cst_39 {dimension_numbers = #tpu.dot_dimension_numbers<[1], [0], [0], [1], [0, 0, 1, 1], [], []>} : vector<32x32xbf16>, vector<32x8xbf16>, vector<32x8xf32> -> vector<32x8xf32>
    %73 = tpu.reciprocal %70 {approx = true} : vector<32x1xf32> -> vector<32x1xf32>
    %74 = vector.broadcast %73 : vector<32x1xf32> to vector<32x8xf32>
    %75 = arith.mulf %72, %74 : vector<32x8xf32>
    %76 = arith.truncf %75 : vector<32x8xf32> to vector<32x8xbf16>
    %c0_40 = arith.constant 0 : index
    %c24 = arith.constant 24 : index
    %77 = vector.load %arg6[%c0_40, %c24] : memref<32x96xbf16, #tpu.memory_space<vmem>>, vector<32x8xbf16>
    %c0_41 = arith.constant 0 : index
    %c56 = arith.constant 56 : index
    %78 = vector.load %arg6[%c0_41, %c56] : memref<32x96xbf16, #tpu.memory_space<vmem>>, vector<32x8xbf16>
    %c0_42 = arith.constant 0 : index
    %c88 = arith.constant 88 : index
    %79 = vector.load %arg6[%c0_42, %c88] : memref<32x96xbf16, #tpu.memory_space<vmem>>, vector<32x8xbf16>
    %cst_43 = arith.constant dense<0.000000e+00> : vector<32x32xf32>
    %80 = tpu.matmul %77, %78, %cst_43 {dimension_numbers = #tpu.dot_dimension_numbers<[1], [1], [0], [0], [0, 0, 1, 0], [], []>} : vector<32x8xbf16>, vector<32x8xbf16>, vector<32x32xf32> -> vector<32x32xf32>
    %81 = vector.broadcast %19 : vector<1x32xf32> to vector<32x32xf32>
    %82 = arith.addf %80, %81 : vector<32x32xf32>
    %cst_44 = arith.constant dense<0xFF800000> : vector<32xf32>
    %83 = vector.multi_reduction <maximumf>, %82, %cst_44 [1] : vector<32x32xf32> to vector<32xf32>
    %84 = vector.shape_cast %83 : vector<32xf32> to vector<32x1xf32>
    %85 = vector.broadcast %84 : vector<32x1xf32> to vector<32x32xf32>
    %86 = arith.subf %82, %85 : vector<32x32xf32>
    %87 = math.exp %86 : vector<32x32xf32>
    %cst_45 = arith.constant dense<0.000000e+00> : vector<32xf32>
    %88 = vector.multi_reduction <add>, %87, %cst_45 [1] : vector<32x32xf32> to vector<32xf32>
    %89 = vector.shape_cast %88 : vector<32xf32> to vector<32x1xf32>
    %90 = arith.truncf %87 : vector<32x32xf32> to vector<32x32xbf16>
    %cst_46 = arith.constant dense<0.000000e+00> : vector<32x8xf32>
    %91 = tpu.matmul %90, %79, %cst_46 {dimension_numbers = #tpu.dot_dimension_numbers<[1], [0], [0], [1], [0, 0, 1, 1], [], []>} : vector<32x32xbf16>, vector<32x8xbf16>, vector<32x8xf32> -> vector<32x8xf32>
    %92 = tpu.reciprocal %89 {approx = true} : vector<32x1xf32> -> vector<32x1xf32>
    %93 = vector.broadcast %92 : vector<32x1xf32> to vector<32x8xf32>
    %94 = arith.mulf %91, %93 : vector<32x8xf32>
    %95 = arith.truncf %94 : vector<32x8xf32> to vector<32x8xbf16>
    %96 = tpu.concatenate %38, %57, %76, %95 in 1 : vector<32x8xbf16>, vector<32x8xbf16>, vector<32x8xbf16>, vector<32x8xbf16> -> vector<32x32xbf16>
    %c0_47 = arith.constant 0 : index
    %c0_48 = arith.constant 0 : index
    %97 = vector.load %arg7[%c0_47, %c0_48] : memref<32x32xbf16, #tpu.memory_space<vmem>>, vector<32x32xbf16>
    tpu.vector_store %arg7[%c0_47, %c0_48], %96 {strides = array<i32>} : memref<32x32xbf16, #tpu.memory_space<vmem>>, vector<32x32xbf16>,
    %c0_49 = arith.constant 0 : index
    %c0_50 = arith.constant 0 : index
    %98 = vector.load %arg7[%c0_49, %c0_50] : memref<32x32xbf16, #tpu.memory_space<vmem>>, vector<32x32xbf16>
    %c0_51 = arith.constant 0 : index
    %c0_52 = arith.constant 0 : index
    %99 = vector.load %arg3[%c0_51, %c0_52] : memref<32x32xbf16, #tpu.memory_space<vmem>>, vector<32x32xbf16>
    %cst_53 = arith.constant dense<0.000000e+00> : vector<32x32xf32>
    %100 = tpu.matmul %98, %99, %cst_53 {dimension_numbers = #tpu.dot_dimension_numbers<[1], [0], [0], [1], [0, 0, 1, 1], [], []>} : vector<32x32xbf16>, vector<32x32xbf16>, vector<32x32xf32> -> vector<32x32xf32>
    %c0_54 = arith.constant 0 : index
    %c0_55 = arith.constant 0 : index
    %101 = vector.load %arg4[%c0_54, %c0_55] : memref<1x32xf32, #tpu.memory_space<vmem>>, vector<1x32xf32>
    %102 = vector.broadcast %101 : vector<1x32xf32> to vector<32x32xf32>
    %103 = arith.addf %100, %102 : vector<32x32xf32>
    %104 = vector.shape_cast %103 : vector<32x32xf32> to vector<1x32x32xf32>
    %c0_56 = arith.constant 0 : index
    %c0_57 = arith.constant 0 : index
    %c0_58 = arith.constant 0 : index
    %105 = vector.load %arg5[%c0_56, %c0_57, %c0_58] : memref<1x32x32xf32, #tpu.memory_space<vmem>>, vector<1x32x32xf32>
    tpu.vector_store %arg5[%c0_56, %c0_57, %c0_58], %104 {strides = array<i32>} : memref<1x32x32xf32, #tpu.memory_space<vmem>>, vector<1x32x32xf32>,
    return
  }
  func.func @transform_0(%arg0: i32) -> (i32, i32, i32) {
    %c0_i32 = arith.constant 0 : i32
    %c0_i32_0 = arith.constant 0 : i32
    %c0_i32_1 = arith.constant 0 : i32
    return %arg0, %c0_i32, %c0_i32_0 : i32, i32, i32
  }
  func.func @transform_1(%arg0: i32) -> (i32, i32) {
    %c0_i32 = arith.constant 0 : i32
    %c0_i32_0 = arith.constant 0 : i32
    %c0_i32_1 = arith.constant 0 : i32
    return %c0_i32, %c0_i32_0 : i32, i32
  }
  func.func @transform_2(%arg0: i32) -> (i32, i32) {
    %c0_i32 = arith.constant 0 : i32
    %c0_i32_0 = arith.constant 0 : i32
    %c0_i32_1 = arith.constant 0 : i32
    return %c0_i32, %c0_i32_0 : i32, i32
  }
  func.func @transform_3(%arg0: i32) -> (i32, i32) {
    %c0_i32 = arith.constant 0 : i32
    %c0_i32_0 = arith.constant 0 : i32
    %c0_i32_1 = arith.constant 0 : i32
    return %c0_i32, %c0_i32_0 : i32, i32
  }
  func.func @transform_4(%arg0: i32) -> (i32, i32, i32) {
    %c0_i32 = arith.constant 0 : i32
    %c0_i32_0 = arith.constant 0 : i32
    %c0_i32_1 = arith.constant 0 : i32
    return %arg0, %c0_i32, %c0_i32_0 : i32, i32, i32
  }
}

</mosaic_0001>

<bundles_post_ra>
// kernel: tpu_custom_call.1
= control target key start
LH: loop header
LB: loop body
LE: loop exit
PB: predicated region body
PF: predicated region fallthrough
CT: control target
= control target key end

     0   :  { %9 = vsyncpa [#allocation5], 0  ;;  %s2057_s0 = inlined_call_operand.hbm [shape: bf16[2,32,32], index: 0, kind: input, shape index: {}]   ;;  %s2058_s1 = inlined_call_operand.hbm [shape: bf16[32,96], index: 1, kind: input, shape index: {}]   ;;  %s2059_s2 = inlined_call_operand.hbm [shape: bf16[32,32], index: 2, kind: input, shape index: {}]   ;;  %s2060_s3 = inlined_call_operand.vmem [shape: f32[1,32], index: 3, kind: input, shape index: {}]   ;;  %s2061_s4 = inlined_call_operand.hbm [shape: f32[2,32,32], index: 4, kind: output, shape index: {}]  }
   0x1   :  { %11 = vsyncpa [#allocation5 + $0x1], 0 }
   0x2   :  { %12 = vsyncpa [#allocation8], 0 }
   0x3   :  { %13 = vsyncpa [#allocation6], 0 }
   0x4   :  { %15 = vsyncpa [#allocation6 + $0x1], 0  ;;  %s1670_s15 = smov 0   ;;  %s1672_s16 = smov 0  }
   0x5   :  { %s1674_s17 = smov 0   ;;  %s1676_s18 = smov 0  }
   0x6 LB: > { %s1691_s19 = sadd.s32 4294967295, %s1622_s18   ;;  %s1197_s20 = sadd.s32 4294967294, %s1622_s18   ;;  %s1622_s18 = sphi %s1676_s18, %s2071_s18   ;;  %s1618_s17 = sphi %s1674_s17, %s2070_s17   ;;  %s1614_s16 = sphi %s1672_s16, %s2069_s16   ;;  %s1610_s15 = sphi %s1670_s15, %s2068_s15  }
   0x7   : > { %p41_p0 = scmp.ne.s32.totalorder %s1614_s16, %s1610_s15  ;;  %p42_p1 = scmp.eq.s32.totalorder %s1691_s19, 0 }
   0x8   : > { %p128_p2 = scmp.eq.s32.totalorder %s1691_s19, 1  ;;  %p134_p3 = scmp.eq.s32.totalorder %s1197_s20, 1 }
   0x9   : > { %p1700_p4 = por %p42_p1, %p41_p0  ;;  %p1198_p5 = scmp.ge.s32.totalorder %s1622_s18, 1 }
   0xa   : > { %p1705_p6 = por %p134_p3, %p41_p0  ;;  %p141_p7 = scmp.lt.s32.totalorder %s1622_s18, 3 }
   0xb   : > { %s152_s25 = sshll.u32 %s2058_s1, 4  ;;  %s1624_s27 = smov [#allocation7]   ;;  %s153_s25 = int_to_ptr.hbm [resolvable:$true] %s152_s25 }
   0xc   : > { %p1713_p8 = pnand %p1198_p5, %p141_p7  ;;  %s154_s28 = sshll.u32 %s1624_s27, 4  ;;  %s155_s28 = int_to_ptr.vmem [resolvable:$true] %s154_s28 }
   0xd   : > { %s166_s5 = sshll.u32 %s2059_s2, 4  ;;  %s1625_s6 = smov 64   ;;  %s167_s5 = int_to_ptr.hbm [resolvable:$true] %s166_s5 }
   0xe   : > { %p1323_p9 = pneg %p1713_p8  ;;  %s1626_s7 = smov 4  }
   0xf   : > { %s1627_s8 = smov [#allocation9]   ;;  %s1732_s10 = sadd.s32 1, %s1622_s18  }
  0x10   : > { %p1324_p10 = pnand %p1323_p9, %p42_p1  ;;  %s168_s9 = sshll.u32 %s1627_s8, 4  ;;  %s169_s9 = int_to_ptr.vmem [resolvable:$true] %s168_s9 }
  0x11   : > { %s28_s11 = sadd.s32 1, %s1618_s17  ;;  %s25_s12 = ssub.s32 %s1622_s18, %s1732_s10 }
  0x12   : > { %1326 = dma.hbm_to_vmem [thread:$0]  (!%p1324_p10), %s153_s25, 256, %s155_s28, [#allocation8], %s1625_s6, %s1625_s6, %s1626_s7  }
  0x13   : > { %1329 = dma.hbm_to_vmem [thread:$0]  (!%p1324_p10), %s167_s5, 256, %s169_s9, [#allocation8], %s1625_s6, %s1625_s6, %s1626_s7  }
  0x14   : > { %p35_p12 = scmp.ne.s32.totalorder %s1618_s17, %s1614_s16  ;;  %p26_p13 = scmp.eq.s32.totalorder %s25_s12, 0 }
  0x15   : > { %p36_p0 = scmp.eq.s32.totalorder %s1622_s18, 0  ;;  %p1340_p5 = scmp.lt.s32.totalorder %s1622_s18, 2 }
  0x16   : > { %p1742_p3 = por %p128_p2, %p35_p12  ;;  %s185_s20 = sand.u32 1, %s1618_s17  }
  0x17   : > { %s1748_s14 = scalar_select %p26_p13, %s1618_s17, %s28_s11  }
  0x18   : > { %p37_p7 = por %p36_p0, %p35_p12  ;;  %s1202_s23 = sshll.u32 %s185_s20, 4 }
  0x19   : > { %s1295_s24 = sshll.u32 %s1622_s18, 4  ;;  %s189_s29 = scalar_lea.vmem [#allocation4], %s1202_s23 }
  0x1a   : > { %s194_s28 = scalar_lea.hbm %s2057_s0, %s1295_s24  ;;  %s197_s30 = sshll.u32 %s189_s29, 4  ;;  %s198_s30 = int_to_ptr.vmem [resolvable:$true] %s197_s30 }
  0x1b   : > { %s195_s5 = sshll.u32 %s194_s28, 4  ;;  %p1755_p2 = pnand %p1340_p5, %p37_p7  ;;  %s196_s5 = int_to_ptr.hbm [resolvable:$true] %s195_s5 }
  0x1c   : > { %s186_s9 = scalar_lea.sflag [#allocation5], %s185_s20  ;;  %s1522_s11 = sshra.s32 %s196_s5, 4  ;;  %s1523_s11 = int_to_ptr.hbm [resolvable:$true] %s1522_s11 }
  0x1d   : > { %s1524_s12 = scalar_lea.hbm %s1523_s11, 16  ;;  %p1526_p10 = pneg %p1755_p2 }
  0x1e   : > { %p1525_p9 = scmp.ne.s32.totalorder %s1523_s11, %s1524_s12  ;;  %s1529_s25 = scalar_lea.hbm %s2057_s0, 32 }
  0x1f   : > { %p1530_p0 = scmp.lt.s32.totalorder %s1523_s11, %s2057_s0  ;;  %p1531_p5 = scmp.lt.s32.totalorder %s1529_s25, %s1524_s12 }
  0x20   : > { %p1527_p12 = pnand %p1526_p10, %p1525_p9 }
  0x21   : > { %p1532_p7 = por %p1531_p5, %p1530_p0 }
  0x22   : > { %p1528_p13 = pneg %p1527_p12 }
  0x24   : > { %p1533_p11 = pnand %p1532_p7, %p1528_p13 }
  0x26   : > { %1536 = shalt.err (!%p1533_p11)
}
  0x27   : > { %1333 = dma.hbm_to_vmem [thread:$0]  (!%p1755_p2), %s196_s5, 256, %s198_s30, %s186_s9, %s1625_s6, %s1625_s6, %s1626_s7  }
  0x28   : > { %209 = sbr.rel (%p1713_p8) target bundleno = 1378 (0x562), region = 36  ;;  %s1775_s20 = sand.u32 (!%p1713_p8), 1, %s1614_s16  }
  0x29   : > { %s1206_s29 = sshll.u32 (!%p1713_p8), %s1775_s20, 4  ;;  %s212_s11 = scalar_lea.sflag (!%p1713_p8), [#allocation5], %s1775_s20 }
  0x2a   : > { %s1779_s12 = scalar_lea.vmem (!%p1713_p8), [#allocation4], %s1206_s29 }
  0x2d   : > { %1597 = dma.done.wait (%p1700_p4), %s212_s11, 256  }
  0x2e   : > { %1599 = vsyncadd (%p1700_p4), %s212_s11, 4294967040 }
  0x2f   : > { %1601 = dma.done.wait (%p42_p1), [#allocation8], 512  }
  0x30   : > { %1603 = vsyncadd (%p42_p1), [#allocation8], 4294966784  ;;  %v1303_v0 = vld [vmem:[#allocation7 + $0x8] sm:$0xff]  ;;  %s1628_s26 = smov 64   ;;  %s1629_s6 = smov 96   ;;  %v1302_v2 = vld [vmem:[#allocation7] sm:$0xff] }
  0x31   : > { %v1301_v1 = vld [vmem:[#allocation7 + $0x8] sm:$0xff]  ;;  %397 = vrot.lane.b32.xlu0 %v1303_v0, %s1628_s26  ;;  %v1300_v3 = vld [vmem:[#allocation7] sm:$0xff]  ;;  %vm282_vm0 = vcmask 261120   ;;  %s1630_s21 = smov 32   ;;  %vm312_vm1 = vcmask 257024   ;;  %vm376_vm2 = vcmask 519424  }
  0x32   : > { %333 = vrot.lane.b32.xlu1 %v1301_v1, %s1629_s6  ;;  %v1299_v4 = vld [vmem:[#allocation7 + $0x8] sm:$0xff]  ;;  %v1298_v5 = vld [vmem:[#allocation7] sm:$0xff]  ;;  %vm440_vm3 = vcmask 781824   ;;  %s1631_s7 = smov 88   ;;  %s1632_s30 = smov 120   ;;  %vm467_vm4 = vcmask 64512  }
  0x33   : > { %295 = vmatpush.bf16.msra.mxu0 %v1299_v4  ;;  %v1296_v8 = vld [vmem:[%s1779_s12] sm:$0xff]  ;;  %v1297_v11 = vld [vmem:[%s1779_s12 + $0x8] sm:$0xff]  ;;  %s1633_s5 = smov 80   ;;  %s1634_s8 = smov 72   ;;  %vm998_vm6 = vcmask 130048   ;;  %vm1003_vm7 = vcmask 195584  }
  0x34   : > { %s1635_s9 = smov 112   ;;  %s1636_s24 = smov 104  }
  0x35   : > { %s1637_s23 = smov 56   ;;  %s1638_s25 = smov 40  }
  0x36   : > { %s1640_s27 = smov 48   ;;  %s1641_s28 = smov 8  }
  0x37   : > { %296 = vmatpush.bf16.msra.mxu0 %v1298_v5  ;;  %s1642_s29 = smov 24   ;;  %s1643_s11 = smov 16  }
  0x38   : > { %s1209_s12 = sshll.u32 %s1775_s20, 5 }
  0x39   : > { %395 = vrot.lane.b32.xlu0 %v1302_v2, %s1628_s26 }
  0x3a   : > { %331 = vrot.lane.b32.xlu1 %v1300_v3, %s1629_s6  ;;  %1226 = vmatmul.msk.bf16.vlgmr.msra.gmra.mxu0 %vm282_vm0, %v1296_v8 }
  0x4a   : > { %1227 = vmatmul.msk.bf16.gmra.mxu0 %vm282_vm0, %v1297_v11 }
  0xa3   : > { %v398_v6 = vpop.permute.xlu0 %397 }
  0xa4   : > { %v334_v7 = vpop.permute.xlu1 %333  ;;  %407 = vmatpush.bf16.msra.mxu2 %v398_v6 }
  0xa5   : > { %343 = vmatpush.bf16.msra.mxu1 %v334_v7 }
  0xab   : > { %v396_v9 = vpop.permute.xlu0 %395 }
  0xac   : > { %v332_v10 = vpop.permute.xlu1 %331  ;;  %408 = vmatpush.bf16.msra.mxu2 %v396_v9 }
  0xad   : > { %344 = vmatpush.bf16.msra.mxu1 %v332_v10 }
  0xaf   : > { %1246 = vmatmul.msk.bf16.vlgmr.msra.gmra.mxu2 %vm282_vm0, %v1296_v8 }
  0xb0   : > { %1236 = vmatmul.msk.bf16.vlgmr.msra.gmra.mxu1 %vm282_vm0, %v1296_v8 }
  0xb7   : > { %v298_v28 = vpop.f32.mrf.mxu0 }
  0xb8   : > { %v308_v29 = vpack.c.bf16 %v298_v28, %v298_v28 }
  0xba   : > { %313 = vst.msk [vmem:[#allocation2] sm:$0xf] %vm312_vm1, %v308_v29 }
  0xbf   : > { %1247 = vmatmul.msk.bf16.gmra.mxu2 %vm282_vm0, %v1297_v11  ;;  %v300_v30 = vpop.f32.mrf.mxu0 }
  0xc0   : > { %1237 = vmatmul.msk.bf16.gmra.mxu1 %vm282_vm0, %v1297_v11  ;;  %v309_v31 = vpack.c.bf16 %v300_v30, %v300_v30  ;;  %v445_v11 = vlaneseq }
  0xc2   : > { %314 = vst.msk [vmem:[#allocation2 + $0x4] sm:$0xf] %vm312_vm1, %v309_v31 }
  0xc7   : > { %v303_v32 = vpop.f32.mrf.mxu0 }
  0xc8   : > { %v310_v33 = vpack.c.bf16 %v303_v32, %v303_v32 }
  0xca   : > { %315 = vst.msk [vmem:[#allocation2 + $0x8] sm:$0xf] %vm312_vm1, %v310_v33 }
  0xcf   : > { %v305_v34 = vpop.f32.mrf.mxu0 }
  0xd0   : > { %v311_v35 = vpack.c.bf16 %v305_v34, %v305_v34 }
  0xd2   : > { %316 = vst.msk [vmem:[#allocation2 + $0xc] sm:$0xf] %vm312_vm1, %v311_v35 }
 0x12d   : > { %v346_v12 = vpop.f32.mrf.mxu1 }
 0x12e   : > { %v356_v25 = vpack.c.bf16 %v346_v12, %v346_v12  ;;  %v446_v12 = vand.u32 127, %v445_v11 }
 0x130   : > { %vm447_vm5 = vcmp.lt.s32.totalorder %v446_v12, 17 }
 0x132   : > { %v410_v13 = vpop.f32.mrf.mxu2 }
 0x133   : > { %v420_v26 = vpack.c.bf16 %v410_v13, %v410_v13  ;;  %v1639_v13 = vmov -1e+30  }
 0x135   : > { %v348_v14 = vpop.f32.mrf.mxu1 }
 0x136   : > { %v357_v22 = vpack.c.bf16 %v348_v14, %v348_v14  ;;  %v1855_v14 = vsel %vm447_vm5, 0.0, %v1639_v13 }
 0x13a   : > { %v412_v15 = vpop.f32.mrf.mxu2 }
 0x13b   : > { %v421_v27 = vpack.c.bf16 %v412_v15, %v412_v15 }
 0x13d   : > { %v351_v16 = vpop.f32.mrf.mxu1 }
 0x13e   : > { %v358_v17 = vpack.c.bf16 %v351_v16, %v351_v16 }
 0x140   : > { %368 = vrot.lane.b32.xlu2 %v358_v17, %s1630_s21 }
 0x142   : > { %v415_v18 = vpop.f32.mrf.mxu2 }
 0x143   : > { %v422_v19 = vpack.c.bf16 %v415_v18, %v415_v18 }
 0x145   : > { %v353_v20 = vpop.f32.mrf.mxu1  ;;  %432 = vrot.lane.b32.xlu0 %v422_v19, %s1628_s26 }
 0x146   : > { %v359_v21 = vpack.c.bf16 %v353_v20, %v353_v20 }
 0x148   : > { %370 = vrot.lane.b32.xlu2 %v359_v21, %s1630_s21 }
 0x14a   : > { %v417_v23 = vpop.f32.mrf.mxu2 }
 0x14b   : > { %v423_v24 = vpack.c.bf16 %v417_v23, %v417_v23 }
 0x14d   : > { %434 = vrot.lane.b32.xlu1 %v423_v24, %s1628_s26  ;;  %366 = vrot.lane.b32.xlu0 %v357_v22, %s1630_s21 }
 0x150   : > { %364 = vrot.lane.b32.xlu2 %v356_v25, %s1630_s21  ;;  %s250_s21 = scalar_lea.vmem [#allocation10], %s1209_s12 }
 0x155   : > { %428 = vrot.lane.b32.xlu1 %v420_v26, %s1628_s26 }
 0x158   : > { %430 = vrot.lane.b32.xlu2 %v421_v27, %s1628_s26 }
 0x19a   : > { %v369_v36 = vpop.permute.xlu2 %368 }
 0x19b   : > { %379 = vst.msk [vmem:[#allocation2 + $0x8] sm:$0xf] %vm376_vm2, %v369_v36 }
 0x1a2   : > { %v371_v37 = vpop.permute.xlu2 %370 }
 0x1a3   : > { %380 = vst.msk [vmem:[#allocation2 + $0xc] sm:$0xf] %vm376_vm2, %v371_v37 }
 0x1aa   : > { %v365_v38 = vpop.permute.xlu2 %364 }
 0x1ab   : > { %377 = vst.msk [vmem:[#allocation2] sm:$0xf] %vm376_vm2, %v365_v38 }
 0x1b2   : > { %v431_v42 = vpop.permute.xlu2 %430 }
 0x1b7   : > { %v433_v39 = vpop.permute.xlu0 %432 }
 0x1b8   : > { %443 = vst.msk [vmem:[#allocation2 + $0x8] sm:$0xf] %vm440_vm3, %v433_v39 }
 0x1bf   : > { %v435_v40 = vpop.permute.xlu1 %434  ;;  %v367_v41 = vpop.permute.xlu0 %366  ;;  %v1254_v43 = vld [vmem:[#allocation2 + $0x8] sm:$0xf] }
 0x1c0   : > { %444 = vst.msk [vmem:[#allocation2 + $0xc] sm:$0xf] %vm440_vm3, %v435_v40 }
 0x1c1   : > { %378 = vst.msk [vmem:[#allocation2 + $0x4] sm:$0xf] %vm376_vm2, %v367_v41 }
 0x1c2   : > { %442 = vst.msk [vmem:[#allocation2 + $0x4] sm:$0xf] %vm440_vm3, %v431_v42 }
 0x1c7   : > { %v1305_v44 = vld [vmem:[#allocation2 + $0x8] sm:$0xf0]  ;;  %v429_v45 = vpop.permute.xlu1 %428 }
 0x1c8   : > { %v1809_v46 = vor.u32 %v1305_v44, %v1254_v43  ;;  %441 = vst.msk [vmem:[#allocation2] sm:$0xf] %vm440_vm3, %v429_v45 }
 0x1ca   : > { %586 = vrot.lane.b32.xlu1 %v1809_v46, %s1631_s7  ;;  %465 = vrot.lane.b32.xlu0 %v1809_v46, %s1629_s6 }
 0x1cf   : > { %v1814_v47 = vld [vmem:[#allocation2] sm:$0xff] }
 0x1d0   : > { %463 = vrot.lane.b32.xlu2 %v1814_v47, %s1629_s6 }
 0x1d2   : > { %580 = vrot.lane.b32.xlu1 %v1814_v47, %s1632_s30  ;;  %584 = vrot.lane.b32.xlu0 %v1814_v47, %s1631_s7  ;;  %s1310_s7 = sshll.u32 %s1691_s19, 5 }
 0x1d8   : > { %706 = vrot.lane.b32.xlu2 %v1809_v46, %s1633_s5 }
 0x1da   : > { %826 = vrot.lane.b32.xlu1 %v1809_v46, %s1634_s8  ;;  %582 = vrot.lane.b32.xlu0 %v1809_v46, %s1632_s30 }
 0x1e0   : > { %704 = vrot.lane.b32.xlu2 %v1814_v47, %s1633_s5 }
 0x1e2   : > { %700 = vrot.lane.b32.xlu1 %v1814_v47, %s1635_s9  ;;  %824 = vrot.lane.b32.xlu0 %v1814_v47, %s1634_s8  ;;  %s1101_s8 = scalar_lea.hbm %s2061_s4, %s1310_s7 }
 0x1e8   : > { %820 = vrot.lane.b32.xlu2 %v1814_v47, %s1636_s24 }
 0x1ea   : > { %822 = vrot.lane.b32.xlu1 %v1809_v46, %s1636_s24  ;;  %702 = vrot.lane.b32.xlu0 %v1809_v46, %s1635_s9  ;;  %s1102_s9 = sshll.u32 %s250_s21, 4  ;;  %s1104_s24 = sshll.u32 %s1101_s8, 4  ;;  %s1103_s9 = int_to_ptr.vmem [resolvable:$true] %s1102_s9  ;;  %s1105_s24 = int_to_ptr.hbm [resolvable:$true] %s1104_s24 }
 0x1f0   : > { %659 = vrot.lane.b32.xlu2 %v1809_v46, %s1637_s23 }
 0x1f2   : > { %539 = vrot.lane.b32.xlu1 %v1809_v46, %s1628_s26  ;;  %657 = vrot.lane.b32.xlu0 %v1814_v47, %s1637_s23  ;;  %s1090_s23 = scalar_lea.sflag [#allocation6], %s1775_s20 }
 0x1fa   : > { %537 = vrot.lane.b32.xlu0 %v1814_v47, %s1628_s26 }
 0x202   : > { %899 = vrot.lane.b32.xlu0 %v1809_v46, %s1638_s25 }
 0x22a   : > { %v464_v48 = vpop.permute.xlu2 %463 }
 0x22b   : > { %v475_v58 = vsel %vm467_vm4, %v464_v48, 0 }
 0x232   : > { %v707_v49 = vpop.permute.xlu2 %706 }
 0x233   : > { %v718_v60 = vsel %vm467_vm4, %v707_v49, 0 }
 0x23a   : > { %v705_v50 = vpop.permute.xlu2 %704 }
 0x23b   : > { %v715_v1 = vsel %vm467_vm4, %v705_v50, 0 }
 0x23c   : > { %v587_v51 = vpop.permute.xlu1 %586  ;;  %v466_v52 = vpop.permute.xlu0 %465 }
 0x23d   : > { %v478_v53 = vsel %vm467_vm4, %v466_v52, 0  ;;  %v598_v54 = vsel %vm467_vm4, %v587_v51, 0 }
 0x23e   : > { %486 = vmatpush.bf16.xpose.msra.mxu3 %v478_v53  ;;  %606 = vmatpush.bf16.xpose.msrb.mxu1 %v598_v54 }
 0x242   : > { %v821_v55 = vpop.permute.xlu2 %820 }
 0x244   : > { %v581_v56 = vpop.permute.xlu1 %580  ;;  %v585_v57 = vpop.permute.xlu0 %584 }
 0x245   : > { %v595_v59 = vsel %vm467_vm4, %v585_v57, 0 }
 0x246   : > { %487 = vmatpush.bf16.xpose.msra.mxu3 %v475_v58  ;;  %607 = vmatpush.bf16.xpose.msrb.mxu1 %v595_v59 }
 0x24a   : > { %v660_v61 = vpop.permute.xlu2 %659 }
 0x24b   : > { %675 = vmatpush.bf16.msrb.mxu2 %v660_v61 }
 0x24c   : > { %v827_v62 = vpop.permute.xlu1 %826  ;;  %v583_v63 = vpop.permute.xlu0 %582 }
 0x24d   : > { %v838_v0 = vsel %vm467_vm4, %v827_v62, 0  ;;  %1256 = vmatmul.msk.bf16.vlgmr.msra.gmra.mxu3 %vm467_vm4, %v1814_v47  ;;  %1260 = vmatmul.msk.bf16.vlgmr.msrb.gmra.mxu1 %vm467_vm4, %v581_v56 }
 0x24e   : > { %726 = vmatpush.bf16.xpose.msrb.mxu3 %v718_v60  ;;  %846 = vmatpush.bf16.xpose.msra.mxu1 %v838_v0 }
 0x254   : > { %v701_v2 = vpop.permute.xlu1 %700  ;;  %v825_v3 = vpop.permute.xlu0 %824 }
 0x255   : > { %v835_v4 = vsel %vm467_vm4, %v825_v3, 0 }
 0x256   : > { %727 = vmatpush.bf16.xpose.msrb.mxu3 %v715_v1  ;;  %847 = vmatpush.bf16.xpose.msra.mxu1 %v835_v4 }
 0x25c   : > { %v823_v5 = vpop.permute.xlu1 %822  ;;  %v703_v6 = vpop.permute.xlu0 %702 }
 0x25d   : > { %1257 = vmatmul.msk.bf16.gmra.mxu3 %vm467_vm4, %v1809_v46  ;;  %1261 = vmatmul.msk.bf16.gmra.mxu1 %vm467_vm4, %v583_v63 }
 0x264   : > { %v540_v7 = vpop.permute.xlu1 %539  ;;  %v658_v8 = vpop.permute.xlu0 %657 }
 0x265   : > { %555 = vmatpush.bf16.msrb.mxu0 %v540_v7  ;;  %676 = vmatpush.bf16.msrb.mxu2 %v658_v8 }
 0x26c   : > { %v538_v9 = vpop.permute.xlu0 %537 }
 0x26d   : > { %556 = vmatpush.bf16.msrb.mxu0 %v538_v9  ;;  %1264 = vmatmul.msk.bf16.vlgmr.msrb.gmra.mxu3 %vm467_vm4, %v701_v2 }
 0x26e   : > { %1268 = vmatmul.msk.bf16.vlgmr.msra.gmra.mxu1 %vm467_vm4, %v821_v55 }
 0x274   : > { %v900_v10 = vpop.permute.xlu0 %899 }
 0x275   : > { %915 = vmatpush.bf16.msra.mxu2 %v900_v10 }
 0x27d   : > { %1265 = vmatmul.msk.bf16.gmra.mxu3 %vm467_vm4, %v703_v6 }
 0x27e   : > { %1269 = vmatmul.msk.bf16.gmra.mxu1 %vm467_vm4, %v823_v5 }
 0x2ca   : > { %v609_v15 = vpop.f32.mrf.mxu1 }
 0x2cb   : > { %v1858_v16 = vadd.f32 %v609_v15, %v1855_v14 }
 0x2cd   : > { %v619_v17 = vsel %vm282_vm0, %v1858_v16, -inf }
 0x2ce   : > { %620 = vmax.xlane.f32.xlu2 %v619_v17 }
 0x2d0   : > { %v489_v18 = vpop.f32.mrf.mxu3 }
 0x2d1   : > { %v1863_v19 = vadd.f32 %v489_v18, %v1855_v14 }
 0x2d2   : > { %v611_v20 = vpop.f32.mrf.mxu1 }
 0x2d3   : > { %v1866_v21 = vadd.f32 %v611_v20, %v1855_v14  ;;  %v499_v22 = vsel %vm282_vm0, %v1863_v19, -inf }
 0x2d4   : > { %500 = vmax.xlane.f32.xlu1 %v499_v22 }
 0x2d5   : > { %v622_v23 = vsel %vm282_vm0, %v1866_v21, -inf }
 0x2d6   : > { %623 = vmax.xlane.f32.xlu0 %v622_v23 }
 0x2d8   : > { %v491_v24 = vpop.f32.mrf.mxu3 }
 0x2d9   : > { %v1873_v25 = vadd.f32 %v491_v24, %v1855_v14 }
 0x2da   : > { %v614_v26 = vpop.f32.mrf.mxu1 }
 0x2db   : > { %v502_v27 = vsel %vm282_vm0, %v1873_v25, -inf  ;;  %v1878_v28 = vadd.f32 %v614_v26, %v1855_v14 }
 0x2dc   : > { %503 = vmax.xlane.f32.xlu2 %v502_v27 }
 0x2dd   : > { %v625_v34 = vsel %vm282_vm0, %v1878_v28, -inf }
 0x2e0   : > { %v494_v29 = vpop.f32.mrf.mxu3 }
 0x2e1   : > { %v1881_v30 = vadd.f32 %v494_v29, %v1855_v14 }
 0x2e2   : > { %v616_v31 = vpop.f32.mrf.mxu1 }
 0x2e3   : > { %v1884_v32 = vadd.f32 %v616_v31, %v1855_v14  ;;  %v505_v33 = vsel %vm282_vm0, %v1881_v30, -inf }
 0x2e4   : > { %506 = vmax.xlane.f32.xlu0 %v505_v33  ;;  %626 = vmax.xlane.f32.xlu2 %v625_v34 }
 0x2e5   : > { %v628_v35 = vsel %vm282_vm0, %v1884_v32, -inf }
 0x2e6   : > { %629 = vmax.xlane.f32.xlu1 %v628_v35 }
 0x2e8   : > { %v496_v36 = vpop.f32.mrf.mxu3 }
 0x2e9   : > { %v1893_v37 = vadd.f32 %v496_v36, %v1855_v14 }
 0x2eb   : > { %v849_v38 = vpop.f32.mrf.mxu1  ;;  %v508_v39 = vsel %vm282_vm0, %v1893_v37, -inf }
 0x2ec   : > { %v1898_v40 = vadd.f32 %v849_v38, %v1855_v14  ;;  %509 = vmax.xlane.f32.xlu2 %v508_v39 }
 0x2ee   : > { %v859_v41 = vsel %vm282_vm0, %v1898_v40, -inf }
 0x2ef   : > { %860 = vmax.xlane.f32.xlu1 %v859_v41 }
 0x2f0   : > { %v729_v42 = vpop.f32.mrf.mxu3 }
 0x2f1   : > { %v1917_v52 = vadd.f32 %v729_v42, %v1855_v14 }
 0x2f3   : > { %v851_v43 = vpop.f32.mrf.mxu1  ;;  %v739_v54 = vsel %vm282_vm0, %v1917_v52, -inf }
 0x2f4   : > { %v1903_v44 = vadd.f32 %v851_v43, %v1855_v14 }
 0x2f6   : > { %v862_v45 = vsel %vm282_vm0, %v1903_v44, -inf }
 0x2f7   : > { %863 = vmax.xlane.f32.xlu0 %v862_v45 }
 0x2f8   : > { %v731_v48 = vpop.f32.mrf.mxu3 }
 0x2f9   : > { %v1908_v49 = vadd.f32 %v731_v48, %v1855_v14 }
 0x2fb   : > { %v742_v50 = vsel %vm282_vm0, %v1908_v49, -inf  ;;  %v854_v51 = vpop.f32.mrf.mxu1 }
 0x2fc   : > { %743 = vmax.xlane.f32.xlu1 %v742_v50  ;;  %v1922_v56 = vadd.f32 %v854_v51, %v1855_v14 }
 0x300   : > { %v734_v53 = vpop.f32.mrf.mxu3 }
 0x301   : > { %v1935_v60 = vadd.f32 %v734_v53, %v1855_v14 }
 0x303   : > { %v856_v55 = vpop.f32.mrf.mxu1  ;;  %v745_v62 = vsel %vm282_vm0, %v1935_v60, -inf }
 0x304   : > { %897 = vrot.lane.b32.xlu2 %v1814_v47, %s1638_s25  ;;  %v1925_v57 = vadd.f32 %v856_v55, %v1855_v14  ;;  %s1566_s25 = sshra.s32 %s1105_s24, 4  ;;  %s1567_s25 = int_to_ptr.hbm [resolvable:$true] %s1566_s25 }
 0x305   : > { %s1568_s19 = scalar_lea.hbm %s1567_s25, 32  ;;  %p1573_p11 = scmp.lt.s32.totalorder %s1567_s25, %s2061_s4 }
 0x306   : > { %p1569_p1 = scmp.ne.s32.totalorder %s1567_s25, %s1568_s19 }
 0x308   : > { %v736_v58 = vpop.f32.mrf.mxu3  ;;  %p1570_p4 = pnand %p1569_p1, %p1742_p3 }
 0x309   : > { %v1932_v59 = vadd.f32 %v736_v58, %v1855_v14 }
 0x30a   : > { %p1571_p8 = pneg %p1570_p4 }
 0x30b   : > { %777 = vrot.lane.b32.xlu0 %v1814_v47, %s1640_s27  ;;  %v868_v47 = vsel %vm282_vm0, %v1925_v57, -inf  ;;  %v748_v61 = vsel %vm282_vm0, %v1932_v59, -inf }
 0x315   : > { %779 = vrot.lane.b32.xlu1 %v1809_v46, %s1640_s27  ;;  %v865_v46 = vsel %vm282_vm0, %v1922_v56, -inf }
 0x32d   : > { %740 = vmax.xlane.f32.xlu2 %v739_v54 }
 0x335   : > { %869 = vmax.xlane.f32.xlu0 %v868_v47  ;;  %866 = vmax.xlane.f32.xlu2 %v865_v46 }
 0x33d   : > { %749 = vmax.xlane.f32.xlu2 %v748_v61 }
 0x33f   : > { %746 = vmax.xlane.f32.xlu1 %v745_v62 }
 0x341   : > { %v621_v63 = vpop.xlane.xlu2 %620 }
 0x342   : > { %v631_v0 = vsub.f32 %v1858_v16, %v621_v63 }
 0x344   : > { %v635_v1 = vmul.f32 1.442695, %v631_v0 }
 0x346   : > { %1398 = vpow2.f32 %v635_v1 }
 0x347   : > { %v501_v2 = vpop.xlane.xlu1 %500 }
 0x348   : > { %v511_v3 = vsub.f32 %v1863_v19, %v501_v2 }
 0x349   : > { %v624_v4 = vpop.xlane.xlu0 %623 }
 0x34a   : > { %v515_v5 = vmul.f32 1.442695, %v511_v3  ;;  %v632_v6 = vsub.f32 %v1866_v21, %v624_v4 }
 0x34c   : > { %v1399_v7 = vpop.eup %1398  ;;  %1400 = vpow2.f32 %v515_v5  ;;  %v637_v8 = vmul.f32 1.442695, %v632_v6 }
 0x34d   : > { %v643_v9 = vsel %vm282_vm0, %v1399_v7, 0.0 }
 0x34e   : > { %1402 = vpow2.f32 %v637_v8  ;;  %644 = vadd.xlane.f32.xlu0 %v643_v9 }
 0x34f   : > { %v504_v10 = vpop.xlane.xlu2 %503 }
 0x350   : > { %v512_v11 = vsub.f32 %v1873_v25, %v504_v10 }
 0x352   : > { %v1401_v12 = vpop.eup %1400  ;;  %v517_v13 = vmul.f32 1.442695, %v512_v11 }
 0x353   : > { %v523_v15 = vsel %vm282_vm0, %v1401_v12, 0.0 }
 0x354   : > { %v1403_v14 = vpop.eup %1402  ;;  %1404 = vpow2.f32 %v517_v13 }
 0x355   : > { %v646_v16 = vsel %vm282_vm0, %v1403_v14, 0.0  ;;  %v655_v17 = vpack.c.bf16 %v1403_v14, %v1399_v7 }
 0x356   : > { %524 = vadd.xlane.f32.xlu0 %v523_v15  ;;  %647 = vadd.xlane.f32.xlu1 %v646_v16 }
 0x357   : > { %v627_v18 = vpop.xlane.xlu2 %626  ;;  %1262 = vmatmul.msk.bf16.vlgmr.msrb.gmra.mxu2 %vm282_vm0, %v655_v17  ;;  %v507_v19 = vpop.xlane.xlu0 %506 }
 0x358   : > { %v633_v20 = vsub.f32 %v1878_v28, %v627_v18  ;;  %v513_v21 = vsub.f32 %v1881_v30, %v507_v19 }
 0x359   : > { %v630_v22 = vpop.xlane.xlu1 %629 }
 0x35a   : > { %v1405_v23 = vpop.eup %1404  ;;  %v639_v24 = vmul.f32 1.442695, %v633_v20  ;;  %v519_v25 = vmul.f32 1.442695, %v513_v21  ;;  %v634_v26 = vsub.f32 %v1884_v32, %v630_v22 }
 0x35b   : > { %v535_v27 = vpack.c.bf16 %v1405_v23, %v1401_v12  ;;  %v526_v62 = vsel %vm282_vm0, %v1405_v23, 0.0 }
 0x35c   : > { %1406 = vpow2.f32 %v639_v24  ;;  %v641_v29 = vmul.f32 1.442695, %v634_v26 }
 0x35d   : > { %1408 = vpow2.f32 %v519_v25  ;;  %1258 = vmatmul.msk.bf16.vlgmr.msrb.gmra.mxu0 %vm282_vm0, %v535_v27 }
 0x35e   : > { %1410 = vpow2.f32 %v641_v29 }
 0x35f   : > { %v510_v31 = vpop.xlane.xlu2 %509 }
 0x360   : > { %v514_v33 = vsub.f32 %v1893_v37, %v510_v31 }
 0x362   : > { %v1407_v34 = vpop.eup %1406  ;;  %v521_v28 = vmul.f32 1.442695, %v514_v33  ;;  %v861_v35 = vpop.xlane.xlu1 %860 }
 0x363   : > { %v1409_v30 = vpop.eup %1408  ;;  %v871_v36 = vsub.f32 %v1898_v40, %v861_v35  ;;  %v649_v38 = vsel %vm282_vm0, %v1407_v34, 0.0 }
 0x364   : > { %v1411_v39 = vpop.eup %1410  ;;  %1412 = vpow2.f32 %v521_v28  ;;  %650 = vadd.xlane.f32.xlu0 %v649_v38  ;;  %v529_v32 = vsel %vm282_vm0, %v1409_v30, 0.0 }
 0x365   : > { %v875_v41 = vmul.f32 1.442695, %v871_v36  ;;  %530 = vadd.xlane.f32.xlu2 %v529_v32  ;;  %v652_v42 = vsel %vm282_vm0, %v1411_v39, 0.0  ;;  %v656_v43 = vpack.c.bf16 %v1411_v39, %v1407_v34 }
 0x366   : > { %653 = vadd.xlane.f32.xlu1 %v652_v42 }
 0x367   : > { %1414 = vpow2.f32 %v875_v41  ;;  %v898_v37 = vpop.permute.xlu2 %897  ;;  %1263 = vmatmul.msk.bf16.gmra.mxu2 %vm282_vm0, %v656_v43 }
 0x368   : > { %916 = vmatpush.bf16.msra.mxu2 %v898_v37 }
 0x36a   : > { %v1413_v45 = vpop.eup %1412  ;;  %v864_v40 = vpop.xlane.xlu0 %863 }
 0x36b   : > { %v872_v48 = vsub.f32 %v1903_v44, %v864_v40  ;;  %v536_v50 = vpack.c.bf16 %v1413_v45, %v1409_v30  ;;  %v532_v0 = vsel %vm282_vm0, %v1413_v45, 0.0 }
 0x36d   : > { %v1415_v51 = vpop.eup %1414  ;;  %v877_v53 = vmul.f32 1.442695, %v872_v48  ;;  %1259 = vmatmul.msk.bf16.gmra.mxu0 %vm282_vm0, %v536_v50 }
 0x36e   : > { %v883_v54 = vsel %vm282_vm0, %v1415_v51, 0.0 }
 0x36f   : > { %1416 = vpow2.f32 %v877_v53  ;;  %884 = vadd.xlane.f32.xlu1 %v883_v54  ;;  %v744_v55 = vpop.xlane.xlu1 %743 }
 0x370   : > { %v752_v47 = vsub.f32 %v1908_v49, %v744_v55 }
 0x372   : > { %v757_v46 = vmul.f32 1.442695, %v752_v47 }
 0x374   : > { %1418 = vpow2.f32 %v757_v46 }
 0x375   : > { %v1417_v58 = vpop.eup %1416 }
 0x376   : > { %v895_v61 = vpack.c.bf16 %v1417_v58, %v1415_v51  ;;  %v886_v18 = vsel %vm282_vm0, %v1417_v58, 0.0 }
 0x377   : > { %527 = vadd.xlane.f32.xlu1 %v526_v62 }
 0x378   : > { %1270 = vmatmul.msk.bf16.vlgmr.msra.gmra.mxu2 %vm282_vm0, %v895_v61 }
 0x37a   : > { %v1419_v44 = vpop.eup %1418 }
 0x37b   : > { %v766_v63 = vsel %vm282_vm0, %v1419_v44, 0.0 }
 0x37c   : > { %767 = vadd.xlane.f32.xlu0 %v766_v63 }
 0x37d   : > { %v778_v2 = vpop.permute.xlu0 %777 }
 0x384   : > { %533 = vadd.xlane.f32.xlu0 %v532_v0 }
 0x387   : > { %v780_v1 = vpop.permute.xlu1 %779 }
 0x388   : > { %795 = vmatpush.bf16.msra.mxu0 %v780_v1 }
 0x38c   : > { %796 = vmatpush.bf16.msra.mxu0 %v778_v2 }
 0x3a0   : > { %v741_v49 = vpop.xlane.xlu2 %740 }
 0x3a1   : > { %v751_v3 = vsub.f32 %v1917_v52, %v741_v49 }
 0x3a3   : > { %v755_v4 = vmul.f32 1.442695, %v751_v3 }
 0x3a5   : > { %1420 = vpow2.f32 %v755_v4 }
 0x3a8   : > { %v870_v5 = vpop.xlane.xlu0 %869  ;;  %v867_v6 = vpop.xlane.xlu2 %866 }
 0x3a9   : > { %v874_v7 = vsub.f32 %v1925_v57, %v870_v5  ;;  %v873_v8 = vsub.f32 %v1922_v56, %v867_v6 }
 0x3ab   : > { %v1421_v9 = vpop.eup %1420  ;;  %v881_v10 = vmul.f32 1.442695, %v874_v7  ;;  %v879_v11 = vmul.f32 1.442695, %v873_v8 }
 0x3ac   : > { %v775_v12 = vpack.c.bf16 %v1419_v44, %v1421_v9  ;;  %v763_v13 = vsel %vm282_vm0, %v1421_v9, 0.0 }
 0x3ad   : > { %1422 = vpow2.f32 %v881_v10  ;;  %764 = vadd.xlane.f32.xlu2 %v763_v13 }
 0x3ae   : > { %1424 = vpow2.f32 %v879_v11  ;;  %1266 = vmatmul.msk.bf16.vlgmr.msra.gmra.mxu0 %vm282_vm0, %v775_v12 }
 0x3b0   : > { %v750_v52 = vpop.xlane.xlu2 %749 }
 0x3b1   : > { %v754_v14 = vsub.f32 %v1932_v59, %v750_v52 }
 0x3b2   : > { %v747_v15 = vpop.xlane.xlu1 %746 }
 0x3b3   : > { %v1423_v16 = vpop.eup %1422  ;;  %v761_v17 = vmul.f32 1.442695, %v754_v14  ;;  %v753_v57 = vsub.f32 %v1935_v60, %v747_v15 }
 0x3b4   : > { %v1425_v56 = vpop.eup %1424  ;;  %v892_v25 = vsel %vm282_vm0, %v1423_v16, 0.0 }
 0x3b5   : > { %1426 = vpow2.f32 %v761_v17  ;;  %v759_v19 = vmul.f32 1.442695, %v753_v57  ;;  %v889_v20 = vsel %vm282_vm0, %v1425_v56, 0.0  ;;  %887 = vadd.xlane.f32.xlu2 %v886_v18  ;;  %v896_v21 = vpack.c.bf16 %v1423_v16, %v1425_v56 }
 0x3b6   : > { %890 = vadd.xlane.f32.xlu1 %v889_v20 }
 0x3b7   : > { %1428 = vpow2.f32 %v759_v19  ;;  %1271 = vmatmul.msk.bf16.gmra.mxu2 %vm282_vm0, %v896_v21 }
 0x3bb   : > { %v1427_v22 = vpop.eup %1426 }
 0x3bc   : > { %v772_v59 = vsel %vm282_vm0, %v1427_v22, 0.0 }
 0x3bd   : > { %v1429_v23 = vpop.eup %1428  ;;  %773 = vadd.xlane.f32.xlu0 %v772_v59 }
 0x3be   : > { %v769_v60 = vsel %vm282_vm0, %v1429_v23, 0.0  ;;  %v776_v24 = vpack.c.bf16 %v1427_v22, %v1429_v23 }
 0x3bf   : > { %770 = vadd.xlane.f32.xlu2 %v769_v60 }
 0x3c0   : > { %1267 = vmatmul.msk.bf16.gmra.mxu0 %vm282_vm0, %v776_v24 }
 0x3c1   : > { %v645_v26 = vpop.xlane.xlu0 %644 }
 0x3c7   : > { %893 = vadd.xlane.f32.xlu2 %v892_v25 }
 0x3c9   : > { %v648_v27 = vpop.xlane.xlu1 %647  ;;  %v525_v29 = vpop.xlane.xlu0 %524 }
 0x3ca   : > { %1430 = vrcp.f32 %v525_v29 }
 0x3cb   : > { %1432 = vrcp.f32 %v645_v26 }
 0x3cc   : > { %1434 = vrcp.f32 %v648_v27 }
 0x3d0   : > { %v1431_v33 = vpop.eup %1430 }
 0x3d1   : > { %v1433_v30 = vpop.eup %1432 }
 0x3d2   : > { %v1435_v39 = vpop.eup %1434 }
 0x3d7   : > { %v651_v43 = vpop.xlane.xlu0 %650 }
 0x3d8   : > { %1436 = vrcp.f32 %v651_v43  ;;  %v531_v58 = vpop.xlane.xlu2 %530 }
 0x3d9   : > { %v654_v31 = vpop.xlane.xlu1 %653 }
 0x3da   : > { %v558_v34 = vpop.f32.mrf.mxu0  ;;  %v678_v28 = vpop.f32.mrf.mxu2 }
 0x3db   : > { %v572_v35 = vmul.f32 %v1431_v33, %v558_v34  ;;  %v692_v36 = vmul.f32 %v1433_v30, %v678_v28 }
 0x3dd   : > { %v696_v41 = vpack.c.bf16 %v692_v36, %v692_v36  ;;  %v576_v61 = vpack.c.bf16 %v572_v35, %v572_v35 }
 0x3de   : > { %v1437_v54 = vpop.eup %1436 }
 0x3df   : > { %v954_v45 = vunpack.c.l.b16 %v696_v41  ;;  %v1982_v3 = vunpack.c.l.b16 %v576_v61 }
 0x3e2   : > { %v885_v38 = vpop.xlane.xlu1 %884  ;;  %v680_v32 = vpop.f32.mrf.mxu2 }
 0x3e3   : > { %v693_v42 = vmul.f32 %v1435_v39, %v680_v32  ;;  %v560_v48 = vpop.f32.mrf.mxu0 }
 0x3e5   : > { %v697_v37 = vpack.c.bf16 %v693_v42, %v693_v42 }
 0x3e7   : > { %v955_v40 = vunpack.c.l.b16 %v697_v37 }
 0x3e9   : > { %v958_v50 = vpack.c.b16 %v955_v40, %v954_v45 }
 0x3ea   : > { %v528_v51 = vpop.xlane.xlu1 %527  ;;  %v683_v53 = vpop.f32.mrf.mxu2 }
 0x3eb   : > { %1438 = vrcp.f32 %v528_v51  ;;  %960 = vrot.lane.b32.xlu1 %v958_v50, %s1641_s28  ;;  %v694_v47 = vmul.f32 %v1437_v54, %v683_v53  ;;  %v563_v1 = vpop.f32.mrf.mxu0 }
 0x3ec   : > { %1440 = vrcp.f32 %v654_v31 }
 0x3ed   : > { %1442 = vrcp.f32 %v531_v58  ;;  %v698_v2 = vpack.c.bf16 %v694_v47, %v694_v47 }
 0x3ef   : > { %v768_v55 = vpop.xlane.xlu0 %767  ;;  %v956_v7 = vunpack.c.l.b16 %v698_v2 }
 0x3f1   : > { %v1439_v46 = vpop.eup %1438 }
 0x3f2   : > { %v573_v62 = vmul.f32 %v1439_v46, %v560_v48  ;;  %v1441_v44 = vpop.eup %1440  ;;  %v685_v63 = vpop.f32.mrf.mxu2 }
 0x3f3   : > { %v695_v49 = vmul.f32 %v1441_v44, %v685_v63  ;;  %v1443_v10 = vpop.eup %1442  ;;  %v565_v52 = vpop.f32.mrf.mxu0 }
 0x3f4   : > { %v577_v0 = vpack.c.bf16 %v573_v62, %v573_v62  ;;  %v574_v12 = vmul.f32 %v1443_v10, %v563_v1  ;;  %v1309_v10 = vld [vmem:[#allocation9 + $0x8] sm:$0xff] }
 0x3f5   : > { %v699_v4 = vpack.c.bf16 %v695_v49, %v695_v49  ;;  %1072 = vmatpush.bf16.msra.mxu3 %v1309_v10 }
 0x3f6   : > { %v1984_v5 = vunpack.c.l.b16 %v577_v0  ;;  %v578_v14 = vpack.c.bf16 %v574_v12, %v574_v12 }
 0x3f7   : > { %v534_v6 = vpop.xlane.xlu0 %533  ;;  %v957_v8 = vunpack.c.l.b16 %v699_v4 }
 0x3f8   : > { %1444 = vrcp.f32 %v534_v6  ;;  %v948_v9 = vpack.c.b16 %v1984_v5, %v1982_v3  ;;  %v1989_v17 = vunpack.c.l.b16 %v578_v14 }
 0x3f9   : > { %v959_v11 = vpack.c.b16 %v957_v8, %v956_v7  ;;  %1446 = vrcp.f32 %v885_v38 }
 0x3fb   : > { %962 = vrot.lane.b32.xlu1 %v959_v11, %s1641_s28  ;;  %v918_v19 = vpop.f32.mrf.mxu2  ;;  %v1308_v11 = vld [vmem:[#allocation9] sm:$0xff] }
 0x3fc   : > { %1073 = vmatpush.bf16.msra.mxu3 %v1308_v11 }
 0x3fe   : > { %v1445_v13 = vpop.eup %1444 }
 0x3ff   : > { %v575_v15 = vmul.f32 %v1445_v13, %v565_v52  ;;  %v1447_v21 = vpop.eup %1446 }
 0x400   : > { %v932_v59 = vmul.f32 %v1447_v21, %v918_v19 }
 0x401   : > { %v579_v16 = vpack.c.bf16 %v575_v15, %v575_v15 }
 0x402   : > { %v936_v25 = vpack.c.bf16 %v932_v59, %v932_v59 }
 0x403   : > { %v1991_v57 = vunpack.c.l.b16 %v579_v16  ;;  %v920_v24 = vpop.f32.mrf.mxu2 }
 0x404   : > { %v982_v28 = vunpack.c.l.b16 %v936_v25 }
 0x405   : > { %v949_v56 = vpack.c.b16 %v1991_v57, %v1989_v17  ;;  %v1397_v17 = vld [vmem:[%s2060_s3] ss:$0 sm:$0xff] }
 0x420   : > { %v765_v18 = vpop.xlane.xlu2 %764 }
 0x421   : > { %1448 = vrcp.f32 %v765_v18 }
 0x427   : > { %v1449_v23 = vpop.eup %1448 }
 0x428   : > { %v888_v20 = vpop.xlane.xlu2 %887 }
 0x429   : > { %1450 = vrcp.f32 %v888_v20  ;;  %v891_v38 = vpop.xlane.xlu1 %890 }
 0x42a   : > { %1452 = vrcp.f32 %v768_v55 }
 0x42b   : > { %v798_v22 = vpop.f32.mrf.mxu0  ;;  %1454 = vrcp.f32 %v891_v38 }
 0x42c   : > { %v812_v26 = vmul.f32 %v1449_v23, %v798_v22 }
 0x42e   : > { %v816_v35 = vpack.c.bf16 %v812_v26, %v812_v26 }
 0x42f   : > { %v1451_v60 = vpop.eup %1450 }
 0x430   : > { %v933_v27 = vmul.f32 %v1451_v60, %v920_v24  ;;  %v1453_v33 = vpop.eup %1452  ;;  %v968_v41 = vunpack.c.l.b16 %v816_v35  ;;  %v774_v40 = vpop.xlane.xlu0 %773 }
 0x431   : > { %v1455_v50 = vpop.eup %1454 }
 0x432   : > { %v771_v29 = vpop.xlane.xlu2 %770  ;;  %v937_v31 = vpack.c.bf16 %v933_v27, %v933_v27 }
 0x433   : > { %v800_v34 = vpop.f32.mrf.mxu0  ;;  %1456 = vrcp.f32 %v771_v29 }
 0x434   : > { %v813_v30 = vmul.f32 %v1453_v33, %v800_v34  ;;  %v983_v36 = vunpack.c.l.b16 %v937_v31 }
 0x436   : > { %v817_v39 = vpack.c.bf16 %v813_v30, %v813_v30  ;;  %v986_v32 = vpack.c.b16 %v983_v36, %v982_v28 }
 0x438   : > { %v969_v42 = vunpack.c.l.b16 %v817_v39  ;;  %988 = vrot.lane.b32.xlu0 %v986_v32, %s1642_s29 }
 0x439   : > { %v1457_v53 = vpop.eup %1456 }
 0x43a   : > { %v972_v43 = vpack.c.b16 %v969_v42, %v968_v41  ;;  %v923_v37 = vpop.f32.mrf.mxu2  ;;  %v894_v45 = vpop.xlane.xlu2 %893 }
 0x43b   : > { %1458 = vrcp.f32 %v894_v45  ;;  %v934_v51 = vmul.f32 %v1455_v50, %v923_v37 }
 0x43c   : > { %974 = vrot.lane.b32.xlu2 %v972_v43, %s1643_s11  ;;  %1460 = vrcp.f32 %v774_v40 }
 0x43d   : > { %v803_v48 = vpop.f32.mrf.mxu0  ;;  %v938_v46 = vpack.c.bf16 %v934_v51, %v934_v51 }
 0x43e   : > { %v814_v55 = vmul.f32 %v1457_v53, %v803_v48 }
 0x43f   : > { %v984_v1 = vunpack.c.l.b16 %v938_v46 }
 0x440   : > { %v818_v63 = vpack.c.bf16 %v814_v55, %v814_v55 }
 0x441   : > { %v1459_v54 = vpop.eup %1458 }
 0x442   : > { %v925_v47 = vpop.f32.mrf.mxu2  ;;  %v1461_v61 = vpop.eup %1460  ;;  %v970_v6 = vunpack.c.l.b16 %v818_v63 }
 0x443   : > { %v935_v58 = vmul.f32 %v1459_v54, %v925_v47 }
 0x445   : > { %v939_v62 = vpack.c.bf16 %v935_v58, %v935_v58  ;;  %v805_v44 = vpop.f32.mrf.mxu0 }
 0x446   : > { %v815_v0 = vmul.f32 %v1461_v61, %v805_v44 }
 0x447   : > { %v985_v2 = vunpack.c.l.b16 %v939_v62 }
 0x448   : > { %v819_v49 = vpack.c.bf16 %v815_v0, %v815_v0 }
 0x449   : > { %v987_v4 = vpack.c.b16 %v985_v2, %v984_v1 }
 0x44a   : > { %v971_v7 = vunpack.c.l.b16 %v819_v49 }
 0x44b   : > { %990 = vrot.lane.b32.xlu2 %v987_v4, %s1642_s29 }
 0x44c   : > { %v973_v8 = vpack.c.b16 %v971_v7, %v970_v6 }
 0x44e   : > { %976 = vrot.lane.b32.xlu0 %v973_v8, %s1643_s11  ;;  %s1572_s11 = scalar_lea.hbm %s2061_s4, 64 }
 0x44f   : > { %p1574_p2 = scmp.lt.s32.totalorder %s1572_s11, %s1568_s19 }
 0x451   : > { %p1575_p9 = por %p1574_p2, %p1573_p11 }
 0x453   : > { %p1576_p10 = pnand %p1575_p9, %p1571_p8 }
 0x45d   : > { %v961_v12 = vpop.permute.xlu1 %960 }
 0x45e   : > { %v994_v52 = vsel %vm467_vm4, %v948_v9, %v961_v12 }
 0x46d   : > { %v963_v3 = vpop.permute.xlu1 %962 }
 0x46e   : > { %v997_v5 = vsel %vm467_vm4, %v949_v56, %v963_v3 }
 0x496   : > { %v975_v13 = vpop.permute.xlu2 %974 }
 0x497   : > { %v1000_v14 = vsel %vm998_vm6, %v994_v52, %v975_v13 }
 0x4a5   : > { %v991_v59 = vpop.permute.xlu2 %990 }
 0x4aa   : > { %v989_v15 = vpop.permute.xlu0 %988 }
 0x4ab   : > { %v1005_v16 = vsel %vm1003_vm7, %v1000_v14, %v989_v15 }
 0x4ac   : > { %v1010_v18 = vunpack.c.l.b16 %v1005_v16  ;;  %v1011_v19 = vunpack.c.h.b16 %v1005_v16 }
 0x4ae   : > { %v1014_v20 = vpack.c.b16 %v1010_v18, %v1010_v18  ;;  %v1015_v21 = vpack.c.b16 %v1011_v19, %v1011_v19 }
 0x4b0   : > { %1022 = vst.msk [vmem:[#allocation3] sm:$0xf] %vm312_vm1, %v1014_v20 }
 0x4b1   : > { %1023 = vst.msk [vmem:[#allocation3 + $0x4] sm:$0xf] %vm312_vm1, %v1015_v21 }
 0x4b8   : > { %v1306_v22 = vld [vmem:[#allocation3] sm:$0xff] }
 0x4b9   : > { %1288 = vmatmul.msk.bf16.vlgmr.msra.gmra.mxu3 %vm282_vm0, %v1306_v22 }
 0x4c0   : > { %v977_v9 = vpop.permute.xlu0 %976 }
 0x4c1   : > { %v1002_v23 = vsel %vm998_vm6, %v997_v5, %v977_v9 }
 0x4c2   : > { %v1007_v60 = vsel %vm1003_vm7, %v1002_v23, %v991_v59 }
 0x4c3   : > { %v1012_v24 = vunpack.c.l.b16 %v1007_v60  ;;  %v1013_v25 = vunpack.c.h.b16 %v1007_v60 }
 0x4c5   : > { %v1016_v26 = vpack.c.b16 %v1012_v24, %v1012_v24  ;;  %v1017_v27 = vpack.c.b16 %v1013_v25, %v1013_v25 }
 0x4c7   : > { %1024 = vst.msk [vmem:[#allocation3 + $0x8] sm:$0xf] %vm312_vm1, %v1016_v26 }
 0x4c8   : > { %1025 = vst.msk [vmem:[#allocation3 + $0xc] sm:$0xf] %vm312_vm1, %v1017_v27 }
 0x4cf   : > { %v1307_v29 = vld [vmem:[#allocation3 + $0x8] sm:$0xff] }
 0x4d0   : > { %1289 = vmatmul.msk.bf16.gmra.mxu3 %vm282_vm0, %v1307_v29 }
 0x53c   : > { %v1075_v57 = vpop.f32.mrf.mxu3 }
 0x53d   : > { %v1076_v56 = vadd.f32 %v1397_v17, %v1075_v57 }
 0x53f   : > { %1085 = vst.msk [vmem:[%s250_s21] sm:$0xff] %vm282_vm0, %v1076_v56 }
 0x544   : > { %v1077_v31 = vpop.f32.mrf.mxu3 }
 0x545   : > { %v1078_v33 = vadd.f32 %v1397_v17, %v1077_v31 }
 0x547   : > { %1086 = vst.msk [vmem:[%s250_s21 + $0x8] sm:$0xff] %vm282_vm0, %v1078_v33 }
 0x553   : > { %v1080_v34 = vpop.f32.mrf.mxu3 }
 0x554   : > { %v1081_v28 = vadd.f32 %v1397_v17, %v1080_v34 }
 0x556   : > { %1087 = vst.msk [vmem:[%s250_s21 + $0x10] sm:$0xff] %vm282_vm0, %v1081_v28 }
 0x55b   : > { %v1082_v35 = vpop.f32.mrf.mxu3 }
 0x55c   : > { %v1083_v30 = vadd.f32 %v1397_v17, %v1082_v35 }
 0x55e   : > { %1088 = vst.msk [vmem:[%s250_s21 + $0x18] sm:$0xff] %vm282_vm0, %v1083_v30 }
 0x55f   : > { %1579 = shalt.err (!%p1576_p10)
}
 0x560   : > { %s1644_s20 = smov 128  }
 0x561   : > { %1321 = dma.vmem_to_hbm [thread:$0]  (%p1742_p3), %s1103_s9, 512, %s1105_s24, %s1090_s23, %s1644_s20, %s1644_s20, %s1641_s28  }
 0x562 PF: > { %s1119_s6 = sand.u32 1, %s1610_s15   ;;  %p2067_p12 = scmp.ge.s32.totalorder %s1622_s18, 2 }
 0x563   : > { %s1120_s21 = scalar_lea.sflag [#allocation6], %s1119_s6 }
 0x564   : > { %p1335_p13 = pnand %p2067_p12, %p1705_p6 }
 0x566   : > { %p1336_p0 = pneg %p1335_p13 }
 0x568   : > { %1605 = dma.done.wait (%p1336_p0), %s1120_s21, 512  }
 0x569   : > { %1607 = vsyncadd (%p1336_p0), %s1120_s21, 4294966784  ;;  %p18_p5 = scmp.ge.s32.totalorder %s1732_s10, 4   ;;  %s2068_s15 = smov %s1614_s16 }
 0x56a   : > { %s2069_s16 = smov %s1618_s17  ;;  %s2070_s17 = smov %s1748_s14 }
 0x56b   : > { %s2071_s18 = smov %s1732_s10  ;;  %20 = sbr.rel (!%p18_p5) target bundleno = 6 (0x6), region = 89 }
 0x570   :  { %1126 = vsyncpa [#allocation5], 1 }
 0x571   :  { %1128 = vsyncpa [#allocation5 + $0x1], 1 }
 0x572   :  { %1129 = vsyncpa [#allocation8], 1 }
 0x573   :  { %1130 = vsyncpa [#allocation6], 1 }
 0x574   :  { %1132 = vsyncpa [#allocation6 + $0x1], 1 }

// kernel: tpu_custom_call.1
= control target key start
LH: loop header
LB: loop body
LE: loop exit
PB: predicated region body
PF: predicated region fallthrough
CT: control target
= control target key end

     0   :  { %9 = vsyncpa [#allocation5], 0  ;;  %s2057_s0 = inlined_call_operand.hbm [shape: bf16[2,32,32], index: 0, kind: input, shape index: {}]   ;;  %s2058_s1 = inlined_call_operand.hbm [shape: bf16[32,96], index: 1, kind: input, shape index: {}]   ;;  %s2059_s2 = inlined_call_operand.hbm [shape: bf16[32,32], index: 2, kind: input, shape index: {}]   ;;  %s2060_s3 = inlined_call_operand.vmem [shape: f32[1,32], index: 3, kind: input, shape index: {}]   ;;  %s2061_s4 = inlined_call_operand.hbm [shape: f32[2,32,32], index: 4, kind: output, shape index: {}]  }
   0x1   :  { %11 = vsyncpa [#allocation5 + $0x1], 0 }
   0x2   :  { %12 = vsyncpa [#allocation8], 0 }
   0x3   :  { %13 = vsyncpa [#allocation6], 0 }
   0x4   :  { %15 = vsyncpa [#allocation6 + $0x1], 0  ;;  %s1670_s15 = smov 0   ;;  %s1672_s16 = smov 0  }
   0x5   :  { %s1674_s17 = smov 0   ;;  %s1676_s18 = smov 0  }
   0x6 LB: > { %s1691_s19 = sadd.s32 4294967295, %s1622_s18   ;;  %s1197_s20 = sadd.s32 4294967294, %s1622_s18   ;;  %s1622_s18 = sphi %s1676_s18, %s2071_s18   ;;  %s1618_s17 = sphi %s1674_s17, %s2070_s17   ;;  %s1614_s16 = sphi %s1672_s16, %s2069_s16   ;;  %s1610_s15 = sphi %s1670_s15, %s2068_s15  }
   0x7   : > { %p41_p0 = scmp.ne.s32.totalorder %s1614_s16, %s1610_s15  ;;  %p42_p1 = scmp.eq.s32.totalorder %s1691_s19, 0 }
   0x8   : > { %p128_p2 = scmp.eq.s32.totalorder %s1691_s19, 1  ;;  %p134_p3 = scmp.eq.s32.totalorder %s1197_s20, 1 }
   0x9   : > { %p1700_p4 = por %p42_p1, %p41_p0  ;;  %p1198_p5 = scmp.ge.s32.totalorder %s1622_s18, 1 }
   0xa   : > { %p1705_p6 = por %p134_p3, %p41_p0  ;;  %p141_p7 = scmp.lt.s32.totalorder %s1622_s18, 3 }
   0xb   : > { %s152_s25 = sshll.u32 %s2058_s1, 4  ;;  %s1624_s27 = smov [#allocation7]   ;;  %s153_s25 = int_to_ptr.hbm [resolvable:$true] %s152_s25 }
   0xc   : > { %p1713_p8 = pnand %p1198_p5, %p141_p7  ;;  %s154_s28 = sshll.u32 %s1624_s27, 4  ;;  %s155_s28 = int_to_ptr.vmem [resolvable:$true] %s154_s28 }
   0xd   : > { %s166_s5 = sshll.u32 %s2059_s2, 4  ;;  %s1625_s6 = smov 64   ;;  %s167_s5 = int_to_ptr.hbm [resolvable:$true] %s166_s5 }
   0xe   : > { %p1323_p9 = pneg %p1713_p8  ;;  %s1626_s7 = smov 4  }
   0xf   : > { %s1627_s8 = smov [#allocation9]   ;;  %s1732_s10 = sadd.s32 1, %s1622_s18  }
  0x10   : > { %p1324_p10 = pnand %p1323_p9, %p42_p1  ;;  %s168_s9 = sshll.u32 %s1627_s8, 4  ;;  %s169_s9 = int_to_ptr.vmem [resolvable:$true] %s168_s9 }
  0x11   : > { %s28_s11 = sadd.s32 1, %s1618_s17  ;;  %s25_s12 = ssub.s32 %s1622_s18, %s1732_s10 }
  0x12   : > { %1326 = dma.hbm_to_vmem [thread:$0]  (!%p1324_p10), %s153_s25, 256, %s155_s28, [#allocation8], %s1625_s6, %s1625_s6, %s1626_s7  }
  0x13   : > { %1329 = dma.hbm_to_vmem [thread:$0]  (!%p1324_p10), %s167_s5, 256, %s169_s9, [#allocation8], %s1625_s6, %s1625_s6, %s1626_s7  }
  0x14   : > { %p35_p12 = scmp.ne.s32.totalorder %s1618_s17, %s1614_s16  ;;  %p26_p13 = scmp.eq.s32.totalorder %s25_s12, 0 }
  0x15   : > { %p36_p0 = scmp.eq.s32.totalorder %s1622_s18, 0  ;;  %p1340_p5 = scmp.lt.s32.totalorder %s1622_s18, 2 }
  0x16   : > { %p1742_p3 = por %p128_p2, %p35_p12  ;;  %s185_s20 = sand.u32 1, %s1618_s17  }
  0x17   : > { %s1748_s14 = scalar_select %p26_p13, %s1618_s17, %s28_s11  }
  0x18   : > { %p37_p7 = por %p36_p0, %p35_p12  ;;  %s1202_s23 = sshll.u32 %s185_s20, 4 }
  0x19   : > { %s1295_s24 = sshll.u32 %s1622_s18, 4  ;;  %s189_s29 = scalar_lea.vmem [#allocation4], %s1202_s23 }
  0x1a   : > { %s194_s28 = scalar_lea.hbm %s2057_s0, %s1295_s24  ;;  %s197_s30 = sshll.u32 %s189_s29, 4  ;;  %s198_s30 = int_to_ptr.vmem [resolvable:$true] %s197_s30 }
  0x1b   : > { %s195_s5 = sshll.u32 %s194_s28, 4  ;;  %p1755_p2 = pnand %p1340_p5, %p37_p7  ;;  %s196_s5 = int_to_ptr.hbm [resolvable:$true] %s195_s5 }
  0x1c   : > { %s186_s9 = scalar_lea.sflag [#allocation5], %s185_s20  ;;  %s1522_s11 = sshra.s32 %s196_s5, 4  ;;  %s1523_s11 = int_to_ptr.hbm [resolvable:$true] %s1522_s11 }
  0x1d   : > { %s1524_s12 = scalar_lea.hbm %s1523_s11, 16  ;;  %p1526_p10 = pneg %p1755_p2 }
  0x1e   : > { %p1525_p9 = scmp.ne.s32.totalorder %s1523_s11, %s1524_s12  ;;  %s1529_s25 = scalar_lea.hbm %s2057_s0, 32 }
  0x1f   : > { %p1530_p0 = scmp.lt.s32.totalorder %s1523_s11, %s2057_s0  ;;  %p1531_p5 = scmp.lt.s32.totalorder %s1529_s25, %s1524_s12 }
  0x20   : > { %p1527_p12 = pnand %p1526_p10, %p1525_p9 }
  0x21   : > { %p1532_p7 = por %p1531_p5, %p1530_p0 }
  0x22   : > { %p1528_p13 = pneg %p1527_p12 }
  0x24   : > { %p1533_p11 = pnand %p1532_p7, %p1528_p13 }
  0x26   : > { %1536 = shalt.err (!%p1533_p11)
}
  0x27   : > { %1333 = dma.hbm_to_vmem [thread:$0]  (!%p1755_p2), %s196_s5, 256, %s198_s30, %s186_s9, %s1625_s6, %s1625_s6, %s1626_s7  }
  0x28   : > { %209 = sbr.rel (%p1713_p8) target bundleno = 1378 (0x562), region = 36  ;;  %s1775_s20 = sand.u32 (!%p1713_p8), 1, %s1614_s16  }
  0x29   : > { %s1206_s29 = sshll.u32 (!%p1713_p8), %s1775_s20, 4  ;;  %s212_s11 = scalar_lea.sflag (!%p1713_p8), [#allocation5], %s1775_s20 }
  0x2a   : > { %s1779_s12 = scalar_lea.vmem (!%p1713_p8), [#allocation4], %s1206_s29 }
  0x2d   : > { %1597 = dma.done.wait (%p1700_p4), %s212_s11, 256  }
  0x2e   : > { %1599 = vsyncadd (%p1700_p4), %s212_s11, 4294967040 }
  0x2f   : > { %1601 = dma.done.wait (%p42_p1), [#allocation8], 512  }
  0x30   : > { %1603 = vsyncadd (%p42_p1), [#allocation8], 4294966784  ;;  %v1303_v0 = vld [vmem:[#allocation7 + $0x8] sm:$0xff]  ;;  %s1628_s26 = smov 64   ;;  %s1629_s6 = smov 96   ;;  %v1302_v2 = vld [vmem:[#allocation7] sm:$0xff] }
  0x31   : > { %v1301_v1 = vld [vmem:[#allocation7 + $0x8] sm:$0xff]  ;;  %397 = vrot.lane.b32.xlu0 %v1303_v0, %s1628_s26  ;;  %v1300_v3 = vld [vmem:[#allocation7] sm:$0xff]  ;;  %vm282_vm0 = vcmask 261120   ;;  %s1630_s21 = smov 32   ;;  %vm312_vm1 = vcmask 257024   ;;  %vm376_vm2 = vcmask 519424  }
  0x32   : > { %333 = vrot.lane.b32.xlu1 %v1301_v1, %s1629_s6  ;;  %v1299_v4 = vld [vmem:[#allocation7 + $0x8] sm:$0xff]  ;;  %v1298_v5 = vld [vmem:[#allocation7] sm:$0xff]  ;;  %vm440_vm3 = vcmask 781824   ;;  %s1631_s7 = smov 88   ;;  %s1632_s30 = smov 120   ;;  %vm467_vm4 = vcmask 64512  }
  0x33   : > { %295 = vmatpush.bf16.msra.mxu0 %v1299_v4  ;;  %v1296_v8 = vld [vmem:[%s1779_s12] sm:$0xff]  ;;  %v1297_v11 = vld [vmem:[%s1779_s12 + $0x8] sm:$0xff]  ;;  %s1633_s5 = smov 80   ;;  %s1634_s8 = smov 72   ;;  %vm998_vm6 = vcmask 130048   ;;  %vm1003_vm7 = vcmask 195584  }
  0x34   : > { %s1635_s9 = smov 112   ;;  %s1636_s24 = smov 104  }
  0x35   : > { %s1637_s23 = smov 56   ;;  %s1638_s25 = smov 40  }
  0x36   : > { %s1640_s27 = smov 48   ;;  %s1641_s28 = smov 8  }
  0x37   : > { %296 = vmatpush.bf16.msra.mxu0 %v1298_v5  ;;  %s1642_s29 = smov 24   ;;  %s1643_s11 = smov 16  }
  0x38   : > { %s1209_s12 = sshll.u32 %s1775_s20, 5 }
  0x39   : > { %395 = vrot.lane.b32.xlu0 %v1302_v2, %s1628_s26 }
  0x3a   : > { %331 = vrot.lane.b32.xlu1 %v1300_v3, %s1629_s6  ;;  %1226 = vmatmul.msk.bf16.vlgmr.msra.gmra.mxu0 %vm282_vm0, %v1296_v8 }
  0x4a   : > { %1227 = vmatmul.msk.bf16.gmra.mxu0 %vm282_vm0, %v1297_v11 }
  0xa3   : > { %v398_v6 = vpop.permute.xlu0 %397 }
  0xa4   : > { %v334_v7 = vpop.permute.xlu1 %333  ;;  %407 = vmatpush.bf16.msra.mxu2 %v398_v6 }
  0xa5   : > { %343 = vmatpush.bf16.msra.mxu1 %v334_v7 }
  0xab   : > { %v396_v9 = vpop.permute.xlu0 %395 }
  0xac   : > { %v332_v10 = vpop.permute.xlu1 %331  ;;  %408 = vmatpush.bf16.msra.mxu2 %v396_v9 }
  0xad   : > { %344 = vmatpush.bf16.msra.mxu1 %v332_v10 }
  0xaf   : > { %1246 = vmatmul.msk.bf16.vlgmr.msra.gmra.mxu2 %vm282_vm0, %v1296_v8 }
  0xb0   : > { %1236 = vmatmul.msk.bf16.vlgmr.msra.gmra.mxu1 %vm282_vm0, %v1296_v8 }
  0xb7   : > { %v298_v28 = vpop.f32.mrf.mxu0 }
  0xb8   : > { %v308_v29 = vpack.c.bf16 %v298_v28, %v298_v28 }
  0xba   : > { %313 = vst.msk [vmem:[#allocation2] sm:$0xf] %vm312_vm1, %v308_v29 }
  0xbf   : > { %1247 = vmatmul.msk.bf16.gmra.mxu2 %vm282_vm0, %v1297_v11  ;;  %v300_v30 = vpop.f32.mrf.mxu0 }
  0xc0   : > { %1237 = vmatmul.msk.bf16.gmra.mxu1 %vm282_vm0, %v1297_v11  ;;  %v309_v31 = vpack.c.bf16 %v300_v30, %v300_v30  ;;  %v445_v11 = vlaneseq }
  0xc2   : > { %314 = vst.msk [vmem:[#allocation2 + $0x4] sm:$0xf] %vm312_vm1, %v309_v31 }
  0xc7   : > { %v303_v32 = vpop.f32.mrf.mxu0 }
  0xc8   : > { %v310_v33 = vpack.c.bf16 %v303_v32, %v303_v32 }
  0xca   : > { %315 = vst.msk [vmem:[#allocation2 + $0x8] sm:$0xf] %vm312_vm1, %v310_v33 }
  0xcf   : > { %v305_v34 = vpop.f32.mrf.mxu0 }
  0xd0   : > { %v311_v35 = vpack.c.bf16 %v305_v34, %v305_v34 }
  0xd2   : > { %316 = vst.msk [vmem:[#allocation2 + $0xc] sm:$0xf] %vm312_vm1, %v311_v35 }
 0x12d   : > { %v346_v12 = vpop.f32.mrf.mxu1 }
 0x12e   : > { %v356_v25 = vpack.c.bf16 %v346_v12, %v346_v12  ;;  %v446_v12 = vand.u32 127, %v445_v11 }
 0x130   : > { %vm447_vm5 = vcmp.lt.s32.totalorder %v446_v12, 17 }
 0x132   : > { %v410_v13 = vpop.f32.mrf.mxu2 }
 0x133   : > { %v420_v26 = vpack.c.bf16 %v410_v13, %v410_v13  ;;  %v1639_v13 = vmov -1e+30  }
 0x135   : > { %v348_v14 = vpop.f32.mrf.mxu1 }
 0x136   : > { %v357_v22 = vpack.c.bf16 %v348_v14, %v348_v14  ;;  %v1855_v14 = vsel %vm447_vm5, 0.0, %v1639_v13 }
 0x13a   : > { %v412_v15 = vpop.f32.mrf.mxu2 }
 0x13b   : > { %v421_v27 = vpack.c.bf16 %v412_v15, %v412_v15 }
 0x13d   : > { %v351_v16 = vpop.f32.mrf.mxu1 }
 0x13e   : > { %v358_v17 = vpack.c.bf16 %v351_v16, %v351_v16 }
 0x140   : > { %368 = vrot.lane.b32.xlu2 %v358_v17, %s1630_s21 }
 0x142   : > { %v415_v18 = vpop.f32.mrf.mxu2 }
 0x143   : > { %v422_v19 = vpack.c.bf16 %v415_v18, %v415_v18 }
 0x145   : > { %v353_v20 = vpop.f32.mrf.mxu1  ;;  %432 = vrot.lane.b32.xlu0 %v422_v19, %s1628_s26 }
 0x146   : > { %v359_v21 = vpack.c.bf16 %v353_v20, %v353_v20 }
 0x148   : > { %370 = vrot.lane.b32.xlu2 %v359_v21, %s1630_s21 }
 0x14a   : > { %v417_v23 = vpop.f32.mrf.mxu2 }
 0x14b   : > { %v423_v24 = vpack.c.bf16 %v417_v23, %v417_v23 }
 0x14d   : > { %434 = vrot.lane.b32.xlu1 %v423_v24, %s1628_s26  ;;  %366 = vrot.lane.b32.xlu0 %v357_v22, %s1630_s21 }
 0x150   : > { %364 = vrot.lane.b32.xlu2 %v356_v25, %s1630_s21  ;;  %s250_s21 = scalar_lea.vmem [#allocation10], %s1209_s12 }
 0x155   : > { %428 = vrot.lane.b32.xlu1 %v420_v26, %s1628_s26 }
 0x158   : > { %430 = vrot.lane.b32.xlu2 %v421_v27, %s1628_s26 }
 0x19a   : > { %v369_v36 = vpop.permute.xlu2 %368 }
 0x19b   : > { %379 = vst.msk [vmem:[#allocation2 + $0x8] sm:$0xf] %vm376_vm2, %v369_v36 }
 0x1a2   : > { %v371_v37 = vpop.permute.xlu2 %370 }
 0x1a3   : > { %380 = vst.msk [vmem:[#allocation2 + $0xc] sm:$0xf] %vm376_vm2, %v371_v37 }
 0x1aa   : > { %v365_v38 = vpop.permute.xlu2 %364 }
 0x1ab   : > { %377 = vst.msk [vmem:[#allocation2] sm:$0xf] %vm376_vm2, %v365_v38 }
 0x1b2   : > { %v431_v42 = vpop.permute.xlu2 %430 }
 0x1b7   : > { %v433_v39 = vpop.permute.xlu0 %432 }
 0x1b8   : > { %443 = vst.msk [vmem:[#allocation2 + $0x8] sm:$0xf] %vm440_vm3, %v433_v39 }
 0x1bf   : > { %v435_v40 = vpop.permute.xlu1 %434  ;;  %v367_v41 = vpop.permute.xlu0 %366  ;;  %v1254_v43 = vld [vmem:[#allocation2 + $0x8] sm:$0xf] }
 0x1c0   : > { %444 = vst.msk [vmem:[#allocation2 + $0xc] sm:$0xf] %vm440_vm3, %v435_v40 }
 0x1c1   : > { %378 = vst.msk [vmem:[#allocation2 + $0x4] sm:$0xf] %vm376_vm2, %v367_v41 }
 0x1c2   : > { %442 = vst.msk [vmem:[#allocation2 + $0x4] sm:$0xf] %vm440_vm3, %v431_v42 }
 0x1c7   : > { %v1305_v44 = vld [vmem:[#allocation2 + $0x8] sm:$0xf0]  ;;  %v429_v45 = vpop.permute.xlu1 %428 }
 0x1c8   : > { %v1809_v46 = vor.u32 %v1305_v44, %v1254_v43  ;;  %441 = vst.msk [vmem:[#allocation2] sm:$0xf] %vm440_vm3, %v429_v45 }
 0x1ca   : > { %586 = vrot.lane.b32.xlu1 %v1809_v46, %s1631_s7  ;;  %465 = vrot.lane.b32.xlu0 %v1809_v46, %s1629_s6 }
 0x1cf   : > { %v1814_v47 = vld [vmem:[#allocation2] sm:$0xff] }
 0x1d0   : > { %463 = vrot.lane.b32.xlu2 %v1814_v47, %s1629_s6 }
 0x1d2   : > { %580 = vrot.lane.b32.xlu1 %v1814_v47, %s1632_s30  ;;  %584 = vrot.lane.b32.xlu0 %v1814_v47, %s1631_s7  ;;  %s1310_s7 = sshll.u32 %s1691_s19, 5 }
 0x1d8   : > { %706 = vrot.lane.b32.xlu2 %v1809_v46, %s1633_s5 }
 0x1da   : > { %826 = vrot.lane.b32.xlu1 %v1809_v46, %s1634_s8  ;;  %582 = vrot.lane.b32.xlu0 %v1809_v46, %s1632_s30 }
 0x1e0   : > { %704 = vrot.lane.b32.xlu2 %v1814_v47, %s1633_s5 }
 0x1e2   : > { %700 = vrot.lane.b32.xlu1 %v1814_v47, %s1635_s9  ;;  %824 = vrot.lane.b32.xlu0 %v1814_v47, %s1634_s8  ;;  %s1101_s8 = scalar_lea.hbm %s2061_s4, %s1310_s7 }
 0x1e8   : > { %820 = vrot.lane.b32.xlu2 %v1814_v47, %s1636_s24 }
 0x1ea   : > { %822 = vrot.lane.b32.xlu1 %v1809_v46, %s1636_s24  ;;  %702 = vrot.lane.b32.xlu0 %v1809_v46, %s1635_s9  ;;  %s1102_s9 = sshll.u32 %s250_s21, 4  ;;  %s1104_s24 = sshll.u32 %s1101_s8, 4  ;;  %s1103_s9 = int_to_ptr.vmem [resolvable:$true] %s1102_s9  ;;  %s1105_s24 = int_to_ptr.hbm [resolvable:$true] %s1104_s24 }
 0x1f0   : > { %659 = vrot.lane.b32.xlu2 %v1809_v46, %s1637_s23 }
 0x1f2   : > { %539 = vrot.lane.b32.xlu1 %v1809_v46, %s1628_s26  ;;  %657 = vrot.lane.b32.xlu0 %v1814_v47, %s1637_s23  ;;  %s1090_s23 = scalar_lea.sflag [#allocation6], %s1775_s20 }
 0x1fa   : > { %537 = vrot.lane.b32.xlu0 %v1814_v47, %s1628_s26 }
 0x202   : > { %899 = vrot.lane.b32.xlu0 %v1809_v46, %s1638_s25 }
 0x22a   : > { %v464_v48 = vpop.permute.xlu2 %463 }
 0x22b   : > { %v475_v58 = vsel %vm467_vm4, %v464_v48, 0 }
 0x232   : > { %v707_v49 = vpop.permute.xlu2 %706 }
 0x233   : > { %v718_v60 = vsel %vm467_vm4, %v707_v49, 0 }
 0x23a   : > { %v705_v50 = vpop.permute.xlu2 %704 }
 0x23b   : > { %v715_v1 = vsel %vm467_vm4, %v705_v50, 0 }
 0x23c   : > { %v587_v51 = vpop.permute.xlu1 %586  ;;  %v466_v52 = vpop.permute.xlu0 %465 }
 0x23d   : > { %v478_v53 = vsel %vm467_vm4, %v466_v52, 0  ;;  %v598_v54 = vsel %vm467_vm4, %v587_v51, 0 }
 0x23e   : > { %486 = vmatpush.bf16.xpose.msra.mxu3 %v478_v53  ;;  %606 = vmatpush.bf16.xpose.msrb.mxu1 %v598_v54 }
 0x242   : > { %v821_v55 = vpop.permute.xlu2 %820 }
 0x244   : > { %v581_v56 = vpop.permute.xlu1 %580  ;;  %v585_v57 = vpop.permute.xlu0 %584 }
 0x245   : > { %v595_v59 = vsel %vm467_vm4, %v585_v57, 0 }
 0x246   : > { %487 = vmatpush.bf16.xpose.msra.mxu3 %v475_v58  ;;  %607 = vmatpush.bf16.xpose.msrb.mxu1 %v595_v59 }
 0x24a   : > { %v660_v61 = vpop.permute.xlu2 %659 }
 0x24b   : > { %675 = vmatpush.bf16.msrb.mxu2 %v660_v61 }
 0x24c   : > { %v827_v62 = vpop.permute.xlu1 %826  ;;  %v583_v63 = vpop.permute.xlu0 %582 }
 0x24d   : > { %v838_v0 = vsel %vm467_vm4, %v827_v62, 0  ;;  %1256 = vmatmul.msk.bf16.vlgmr.msra.gmra.mxu3 %vm467_vm4, %v1814_v47  ;;  %1260 = vmatmul.msk.bf16.vlgmr.msrb.gmra.mxu1 %vm467_vm4, %v581_v56 }
 0x24e   : > { %726 = vmatpush.bf16.xpose.msrb.mxu3 %v718_v60  ;;  %846 = vmatpush.bf16.xpose.msra.mxu1 %v838_v0 }
 0x254   : > { %v701_v2 = vpop.permute.xlu1 %700  ;;  %v825_v3 = vpop.permute.xlu0 %824 }
 0x255   : > { %v835_v4 = vsel %vm467_vm4, %v825_v3, 0 }
 0x256   : > { %727 = vmatpush.bf16.xpose.msrb.mxu3 %v715_v1  ;;  %847 = vmatpush.bf16.xpose.msra.mxu1 %v835_v4 }
 0x25c   : > { %v823_v5 = vpop.permute.xlu1 %822  ;;  %v703_v6 = vpop.permute.xlu0 %702 }
 0x25d   : > { %1257 = vmatmul.msk.bf16.gmra.mxu3 %vm467_vm4, %v1809_v46  ;;  %1261 = vmatmul.msk.bf16.gmra.mxu1 %vm467_vm4, %v583_v63 }
 0x264   : > { %v540_v7 = vpop.permute.xlu1 %539  ;;  %v658_v8 = vpop.permute.xlu0 %657 }
 0x265   : > { %555 = vmatpush.bf16.msrb.mxu0 %v540_v7  ;;  %676 = vmatpush.bf16.msrb.mxu2 %v658_v8 }
 0x26c   : > { %v538_v9 = vpop.permute.xlu0 %537 }
 0x26d   : > { %556 = vmatpush.bf16.msrb.mxu0 %v538_v9  ;;  %1264 = vmatmul.msk.bf16.vlgmr.msrb.gmra.mxu3 %vm467_vm4, %v701_v2 }
 0x26e   : > { %1268 = vmatmul.msk.bf16.vlgmr.msra.gmra.mxu1 %vm467_vm4, %v821_v55 }
 0x274   : > { %v900_v10 = vpop.permute.xlu0 %899 }
 0x275   : > { %915 = vmatpush.bf16.msra.mxu2 %v900_v10 }
 0x27d   : > { %1265 = vmatmul.msk.bf16.gmra.mxu3 %vm467_vm4, %v703_v6 }
 0x27e   : > { %1269 = vmatmul.msk.bf16.gmra.mxu1 %vm467_vm4, %v823_v5 }
 0x2ca   : > { %v609_v15 = vpop.f32.mrf.mxu1 }
 0x2cb   : > { %v1858_v16 = vadd.f32 %v609_v15, %v1855_v14 }
 0x2cd   : > { %v619_v17 = vsel %vm282_vm0, %v1858_v16, -inf }
 0x2ce   : > { %620 = vmax.xlane.f32.xlu2 %v619_v17 }
 0x2d0   : > { %v489_v18 = vpop.f32.mrf.mxu3 }
 0x2d1   : > { %v1863_v19 = vadd.f32 %v489_v18, %v1855_v14 }
 0x2d2   : > { %v611_v20 = vpop.f32.mrf.mxu1 }
 0x2d3   : > { %v1866_v21 = vadd.f32 %v611_v20, %v1855_v14  ;;  %v499_v22 = vsel %vm282_vm0, %v1863_v19, -inf }
 0x2d4   : > { %500 = vmax.xlane.f32.xlu1 %v499_v22 }
 0x2d5   : > { %v622_v23 = vsel %vm282_vm0, %v1866_v21, -inf }
 0x2d6   : > { %623 = vmax.xlane.f32.xlu0 %v622_v23 }
 0x2d8   : > { %v491_v24 = vpop.f32.mrf.mxu3 }
 0x2d9   : > { %v1873_v25 = vadd.f32 %v491_v24, %v1855_v14 }
 0x2da   : > { %v614_v26 = vpop.f32.mrf.mxu1 }
 0x2db   : > { %v502_v27 = vsel %vm282_vm0, %v1873_v25, -inf  ;;  %v1878_v28 = vadd.f32 %v614_v26, %v1855_v14 }
 0x2dc   : > { %503 = vmax.xlane.f32.xlu2 %v502_v27 }
 0x2dd   : > { %v625_v34 = vsel %vm282_vm0, %v1878_v28, -inf }
 0x2e0   : > { %v494_v29 = vpop.f32.mrf.mxu3 }
 0x2e1   : > { %v1881_v30 = vadd.f32 %v494_v29, %v1855_v14 }
 0x2e2   : > { %v616_v31 = vpop.f32.mrf.mxu1 }
 0x2e3   : > { %v1884_v32 = vadd.f32 %v616_v31, %v1855_v14  ;;  %v505_v33 = vsel %vm282_vm0, %v1881_v30, -inf }
 0x2e4   : > { %506 = vmax.xlane.f32.xlu0 %v505_v33  ;;  %626 = vmax.xlane.f32.xlu2 %v625_v34 }
 0x2e5   : > { %v628_v35 = vsel %vm282_vm0, %v1884_v32, -inf }
 0x2e6   : > { %629 = vmax.xlane.f32.xlu1 %v628_v35 }
 0x2e8   : > { %v496_v36 = vpop.f32.mrf.mxu3 }
 0x2e9   : > { %v1893_v37 = vadd.f32 %v496_v36, %v1855_v14 }
 0x2eb   : > { %v849_v38 = vpop.f32.mrf.mxu1  ;;  %v508_v39 = vsel %vm282_vm0, %v1893_v37, -inf }
 0x2ec   : > { %v1898_v40 = vadd.f32 %v849_v38, %v1855_v14  ;;  %509 = vmax.xlane.f32.xlu2 %v508_v39 }
 0x2ee   : > { %v859_v41 = vsel %vm282_vm0, %v1898_v40, -inf }
 0x2ef   : > { %860 = vmax.xlane.f32.xlu1 %v859_v41 }
 0x2f0   : > { %v729_v42 = vpop.f32.mrf.mxu3 }
 0x2f1   : > { %v1917_v52 = vadd.f32 %v729_v42, %v1855_v14 }
 0x2f3   : > { %v851_v43 = vpop.f32.mrf.mxu1  ;;  %v739_v54 = vsel %vm282_vm0, %v1917_v52, -inf }
 0x2f4   : > { %v1903_v44 = vadd.f32 %v851_v43, %v1855_v14 }
 0x2f6   : > { %v862_v45 = vsel %vm282_vm0, %v1903_v44, -inf }
 0x2f7   : > { %863 = vmax.xlane.f32.xlu0 %v862_v45 }
 0x2f8   : > { %v731_v48 = vpop.f32.mrf.mxu3 }
 0x2f9   : > { %v1908_v49 = vadd.f32 %v731_v48, %v1855_v14 }
 0x2fb   : > { %v742_v50 = vsel %vm282_vm0, %v1908_v49, -inf  ;;  %v854_v51 = vpop.f32.mrf.mxu1 }
 0x2fc   : > { %743 = vmax.xlane.f32.xlu1 %v742_v50  ;;  %v1922_v56 = vadd.f32 %v854_v51, %v1855_v14 }
 0x300   : > { %v734_v53 = vpop.f32.mrf.mxu3 }
 0x301   : > { %v1935_v60 = vadd.f32 %v734_v53, %v1855_v14 }
 0x303   : > { %v856_v55 = vpop.f32.mrf.mxu1  ;;  %v745_v62 = vsel %vm282_vm0, %v1935_v60, -inf }
 0x304   : > { %897 = vrot.lane.b32.xlu2 %v1814_v47, %s1638_s25  ;;  %v1925_v57 = vadd.f32 %v856_v55, %v1855_v14  ;;  %s1566_s25 = sshra.s32 %s1105_s24, 4  ;;  %s1567_s25 = int_to_ptr.hbm [resolvable:$true] %s1566_s25 }
 0x305   : > { %s1568_s19 = scalar_lea.hbm %s1567_s25, 32  ;;  %p1573_p11 = scmp.lt.s32.totalorder %s1567_s25, %s2061_s4 }
 0x306   : > { %p1569_p1 = scmp.ne.s32.totalorder %s1567_s25, %s1568_s19 }
 0x308   : > { %v736_v58 = vpop.f32.mrf.mxu3  ;;  %p1570_p4 = pnand %p1569_p1, %p1742_p3 }
 0x309   : > { %v1932_v59 = vadd.f32 %v736_v58, %v1855_v14 }
 0x30a   : > { %p1571_p8 = pneg %p1570_p4 }
 0x30b   : > { %777 = vrot.lane.b32.xlu0 %v1814_v47, %s1640_s27  ;;  %v868_v47 = vsel %vm282_vm0, %v1925_v57, -inf  ;;  %v748_v61 = vsel %vm282_vm0, %v1932_v59, -inf }
 0x315   : > { %779 = vrot.lane.b32.xlu1 %v1809_v46, %s1640_s27  ;;  %v865_v46 = vsel %vm282_vm0, %v1922_v56, -inf }
 0x32d   : > { %740 = vmax.xlane.f32.xlu2 %v739_v54 }
 0x335   : > { %869 = vmax.xlane.f32.xlu0 %v868_v47  ;;  %866 = vmax.xlane.f32.xlu2 %v865_v46 }
 0x33d   : > { %749 = vmax.xlane.f32.xlu2 %v748_v61 }
 0x33f   : > { %746 = vmax.xlane.f32.xlu1 %v745_v62 }
 0x341   : > { %v621_v63 = vpop.xlane.xlu2 %620 }
 0x342   : > { %v631_v0 = vsub.f32 %v1858_v16, %v621_v63 }
 0x344   : > { %v635_v1 = vmul.f32 1.442695, %v631_v0 }
 0x346   : > { %1398 = vpow2.f32 %v635_v1 }
 0x347   : > { %v501_v2 = vpop.xlane.xlu1 %500 }
 0x348   : > { %v511_v3 = vsub.f32 %v1863_v19, %v501_v2 }
 0x349   : > { %v624_v4 = vpop.xlane.xlu0 %623 }
 0x34a   : > { %v515_v5 = vmul.f32 1.442695, %v511_v3  ;;  %v632_v6 = vsub.f32 %v1866_v21, %v624_v4 }
 0x34c   : > { %v1399_v7 = vpop.eup %1398  ;;  %1400 = vpow2.f32 %v515_v5  ;;  %v637_v8 = vmul.f32 1.442695, %v632_v6 }
 0x34d   : > { %v643_v9 = vsel %vm282_vm0, %v1399_v7, 0.0 }
 0x34e   : > { %1402 = vpow2.f32 %v637_v8  ;;  %644 = vadd.xlane.f32.xlu0 %v643_v9 }
 0x34f   : > { %v504_v10 = vpop.xlane.xlu2 %503 }
 0x350   : > { %v512_v11 = vsub.f32 %v1873_v25, %v504_v10 }
 0x352   : > { %v1401_v12 = vpop.eup %1400  ;;  %v517_v13 = vmul.f32 1.442695, %v512_v11 }
 0x353   : > { %v523_v15 = vsel %vm282_vm0, %v1401_v12, 0.0 }
 0x354   : > { %v1403_v14 = vpop.eup %1402  ;;  %1404 = vpow2.f32 %v517_v13 }
 0x355   : > { %v646_v16 = vsel %vm282_vm0, %v1403_v14, 0.0  ;;  %v655_v17 = vpack.c.bf16 %v1403_v14, %v1399_v7 }
 0x356   : > { %524 = vadd.xlane.f32.xlu0 %v523_v15  ;;  %647 = vadd.xlane.f32.xlu1 %v646_v16 }
 0x357   : > { %v627_v18 = vpop.xlane.xlu2 %626  ;;  %1262 = vmatmul.msk.bf16.vlgmr.msrb.gmra.mxu2 %vm282_vm0, %v655_v17  ;;  %v507_v19 = vpop.xlane.xlu0 %506 }
 0x358   : > { %v633_v20 = vsub.f32 %v1878_v28, %v627_v18  ;;  %v513_v21 = vsub.f32 %v1881_v30, %v507_v19 }
 0x359   : > { %v630_v22 = vpop.xlane.xlu1 %629 }
 0x35a   : > { %v1405_v23 = vpop.eup %1404  ;;  %v639_v24 = vmul.f32 1.442695, %v633_v20  ;;  %v519_v25 = vmul.f32 1.442695, %v513_v21  ;;  %v634_v26 = vsub.f32 %v1884_v32, %v630_v22 }
 0x35b   : > { %v535_v27 = vpack.c.bf16 %v1405_v23, %v1401_v12  ;;  %v526_v62 = vsel %vm282_vm0, %v1405_v23, 0.0 }
 0x35c   : > { %1406 = vpow2.f32 %v639_v24  ;;  %v641_v29 = vmul.f32 1.442695, %v634_v26 }
 0x35d   : > { %1408 = vpow2.f32 %v519_v25  ;;  %1258 = vmatmul.msk.bf16.vlgmr.msrb.gmra.mxu0 %vm282_vm0, %v535_v27 }
 0x35e   : > { %1410 = vpow2.f32 %v641_v29 }
 0x35f   : > { %v510_v31 = vpop.xlane.xlu2 %509 }
 0x360   : > { %v514_v33 = vsub.f32 %v1893_v37, %v510_v31 }
 0x362   : > { %v1407_v34 = vpop.eup %1406  ;;  %v521_v28 = vmul.f32 1.442695, %v514_v33  ;;  %v861_v35 = vpop.xlane.xlu1 %860 }
 0x363   : > { %v1409_v30 = vpop.eup %1408  ;;  %v871_v36 = vsub.f32 %v1898_v40, %v861_v35  ;;  %v649_v38 = vsel %vm282_vm0, %v1407_v34, 0.0 }
 0x364   : > { %v1411_v39 = vpop.eup %1410  ;;  %1412 = vpow2.f32 %v521_v28  ;;  %650 = vadd.xlane.f32.xlu0 %v649_v38  ;;  %v529_v32 = vsel %vm282_vm0, %v1409_v30, 0.0 }
 0x365   : > { %v875_v41 = vmul.f32 1.442695, %v871_v36  ;;  %530 = vadd.xlane.f32.xlu2 %v529_v32  ;;  %v652_v42 = vsel %vm282_vm0, %v1411_v39, 0.0  ;;  %v656_v43 = vpack.c.bf16 %v1411_v39, %v1407_v34 }
 0x366   : > { %653 = vadd.xlane.f32.xlu1 %v652_v42 }
 0x367   : > { %1414 = vpow2.f32 %v875_v41  ;;  %v898_v37 = vpop.permute.xlu2 %897  ;;  %1263 = vmatmul.msk.bf16.gmra.mxu2 %vm282_vm0, %v656_v43 }
 0x368   : > { %916 = vmatpush.bf16.msra.mxu2 %v898_v37 }
 0x36a   : > { %v1413_v45 = vpop.eup %1412  ;;  %v864_v40 = vpop.xlane.xlu0 %863 }
 0x36b   : > { %v872_v48 = vsub.f32 %v1903_v44, %v864_v40  ;;  %v536_v50 = vpack.c.bf16 %v1413_v45, %v1409_v30  ;;  %v532_v0 = vsel %vm282_vm0, %v1413_v45, 0.0 }
 0x36d   : > { %v1415_v51 = vpop.eup %1414  ;;  %v877_v53 = vmul.f32 1.442695, %v872_v48  ;;  %1259 = vmatmul.msk.bf16.gmra.mxu0 %vm282_vm0, %v536_v50 }
 0x36e   : > { %v883_v54 = vsel %vm282_vm0, %v1415_v51, 0.0 }
 0x36f   : > { %1416 = vpow2.f32 %v877_v53  ;;  %884 = vadd.xlane.f32.xlu1 %v883_v54  ;;  %v744_v55 = vpop.xlane.xlu1 %743 }
 0x370   : > { %v752_v47 = vsub.f32 %v1908_v49, %v744_v55 }
 0x372   : > { %v757_v46 = vmul.f32 1.442695, %v752_v47 }
 0x374   : > { %1418 = vpow2.f32 %v757_v46 }
 0x375   : > { %v1417_v58 = vpop.eup %1416 }
 0x376   : > { %v895_v61 = vpack.c.bf16 %v1417_v58, %v1415_v51  ;;  %v886_v18 = vsel %vm282_vm0, %v1417_v58, 0.0 }
 0x377   : > { %527 = vadd.xlane.f32.xlu1 %v526_v62 }
 0x378   : > { %1270 = vmatmul.msk.bf16.vlgmr.msra.gmra.mxu2 %vm282_vm0, %v895_v61 }
 0x37a   : > { %v1419_v44 = vpop.eup %1418 }
 0x37b   : > { %v766_v63 = vsel %vm282_vm0, %v1419_v44, 0.0 }
 0x37c   : > { %767 = vadd.xlane.f32.xlu0 %v766_v63 }
 0x37d   : > { %v778_v2 = vpop.permute.xlu0 %777 }
 0x384   : > { %533 = vadd.xlane.f32.xlu0 %v532_v0 }
 0x387   : > { %v780_v1 = vpop.permute.xlu1 %779 }
 0x388   : > { %795 = vmatpush.bf16.msra.mxu0 %v780_v1 }
 0x38c   : > { %796 = vmatpush.bf16.msra.mxu0 %v778_v2 }
 0x3a0   : > { %v741_v49 = vpop.xlane.xlu2 %740 }
 0x3a1   : > { %v751_v3 = vsub.f32 %v1917_v52, %v741_v49 }
 0x3a3   : > { %v755_v4 = vmul.f32 1.442695, %v751_v3 }
 0x3a5   : > { %1420 = vpow2.f32 %v755_v4 }
 0x3a8   : > { %v870_v5 = vpop.xlane.xlu0 %869  ;;  %v867_v6 = vpop.xlane.xlu2 %866 }
 0x3a9   : > { %v874_v7 = vsub.f32 %v1925_v57, %v870_v5  ;;  %v873_v8 = vsub.f32 %v1922_v56, %v867_v6 }
 0x3ab   : > { %v1421_v9 = vpop.eup %1420  ;;  %v881_v10 = vmul.f32 1.442695, %v874_v7  ;;  %v879_v11 = vmul.f32 1.442695, %v873_v8 }
 0x3ac   : > { %v775_v12 = vpack.c.bf16 %v1419_v44, %v1421_v9  ;;  %v763_v13 = vsel %vm282_vm0, %v1421_v9, 0.0 }
 0x3ad   : > { %1422 = vpow2.f32 %v881_v10  ;;  %764 = vadd.xlane.f32.xlu2 %v763_v13 }
 0x3ae   : > { %1424 = vpow2.f32 %v879_v11  ;;  %1266 = vmatmul.msk.bf16.vlgmr.msra.gmra.mxu0 %vm282_vm0, %v775_v12 }
 0x3b0   : > { %v750_v52 = vpop.xlane.xlu2 %749 }
 0x3b1   : > { %v754_v14 = vsub.f32 %v1932_v59, %v750_v52 }
 0x3b2   : > { %v747_v15 = vpop.xlane.xlu1 %746 }
 0x3b3   : > { %v1423_v16 = vpop.eup %1422  ;;  %v761_v17 = vmul.f32 1.442695, %v754_v14  ;;  %v753_v57 = vsub.f32 %v1935_v60, %v747_v15 }
 0x3b4   : > { %v1425_v56 = vpop.eup %1424  ;;  %v892_v25 = vsel %vm282_vm0, %v1423_v16, 0.0 }
 0x3b5   : > { %1426 = vpow2.f32 %v761_v17  ;;  %v759_v19 = vmul.f32 1.442695, %v753_v57  ;;  %v889_v20 = vsel %vm282_vm0, %v1425_v56, 0.0  ;;  %887 = vadd.xlane.f32.xlu2 %v886_v18  ;;  %v896_v21 = vpack.c.bf16 %v1423_v16, %v1425_v56 }
 0x3b6   : > { %890 = vadd.xlane.f32.xlu1 %v889_v20 }
 0x3b7   : > { %1428 = vpow2.f32 %v759_v19  ;;  %1271 = vmatmul.msk.bf16.gmra.mxu2 %vm282_vm0, %v896_v21 }
 0x3bb   : > { %v1427_v22 = vpop.eup %1426 }
 0x3bc   : > { %v772_v59 = vsel %vm282_vm0, %v1427_v22, 0.0 }
 0x3bd   : > { %v1429_v23 = vpop.eup %1428  ;;  %773 = vadd.xlane.f32.xlu0 %v772_v59 }
 0x3be   : > { %v769_v60 = vsel %vm282_vm0, %v1429_v23, 0.0  ;;  %v776_v24 = vpack.c.bf16 %v1427_v22, %v1429_v23 }
 0x3bf   : > { %770 = vadd.xlane.f32.xlu2 %v769_v60 }
 0x3c0   : > { %1267 = vmatmul.msk.bf16.gmra.mxu0 %vm282_vm0, %v776_v24 }
 0x3c1   : > { %v645_v26 = vpop.xlane.xlu0 %644 }
 0x3c7   : > { %893 = vadd.xlane.f32.xlu2 %v892_v25 }
 0x3c9   : > { %v648_v27 = vpop.xlane.xlu1 %647  ;;  %v525_v29 = vpop.xlane.xlu0 %524 }
 0x3ca   : > { %1430 = vrcp.f32 %v525_v29 }
 0x3cb   : > { %1432 = vrcp.f32 %v645_v26 }
 0x3cc   : > { %1434 = vrcp.f32 %v648_v27 }
 0x3d0   : > { %v1431_v33 = vpop.eup %1430 }
 0x3d1   : > { %v1433_v30 = vpop.eup %1432 }
 0x3d2   : > { %v1435_v39 = vpop.eup %1434 }
 0x3d7   : > { %v651_v43 = vpop.xlane.xlu0 %650 }
 0x3d8   : > { %1436 = vrcp.f32 %v651_v43  ;;  %v531_v58 = vpop.xlane.xlu2 %530 }
 0x3d9   : > { %v654_v31 = vpop.xlane.xlu1 %653 }
 0x3da   : > { %v558_v34 = vpop.f32.mrf.mxu0  ;;  %v678_v28 = vpop.f32.mrf.mxu2 }
 0x3db   : > { %v572_v35 = vmul.f32 %v1431_v33, %v558_v34  ;;  %v692_v36 = vmul.f32 %v1433_v30, %v678_v28 }
 0x3dd   : > { %v696_v41 = vpack.c.bf16 %v692_v36, %v692_v36  ;;  %v576_v61 = vpack.c.bf16 %v572_v35, %v572_v35 }
 0x3de   : > { %v1437_v54 = vpop.eup %1436 }
 0x3df   : > { %v954_v45 = vunpack.c.l.b16 %v696_v41  ;;  %v1982_v3 = vunpack.c.l.b16 %v576_v61 }
 0x3e2   : > { %v885_v38 = vpop.xlane.xlu1 %884  ;;  %v680_v32 = vpop.f32.mrf.mxu2 }
 0x3e3   : > { %v693_v42 = vmul.f32 %v1435_v39, %v680_v32  ;;  %v560_v48 = vpop.f32.mrf.mxu0 }
 0x3e5   : > { %v697_v37 = vpack.c.bf16 %v693_v42, %v693_v42 }
 0x3e7   : > { %v955_v40 = vunpack.c.l.b16 %v697_v37 }
 0x3e9   : > { %v958_v50 = vpack.c.b16 %v955_v40, %v954_v45 }
 0x3ea   : > { %v528_v51 = vpop.xlane.xlu1 %527  ;;  %v683_v53 = vpop.f32.mrf.mxu2 }
 0x3eb   : > { %1438 = vrcp.f32 %v528_v51  ;;  %960 = vrot.lane.b32.xlu1 %v958_v50, %s1641_s28  ;;  %v694_v47 = vmul.f32 %v1437_v54, %v683_v53  ;;  %v563_v1 = vpop.f32.mrf.mxu0 }
 0x3ec   : > { %1440 = vrcp.f32 %v654_v31 }
 0x3ed   : > { %1442 = vrcp.f32 %v531_v58  ;;  %v698_v2 = vpack.c.bf16 %v694_v47, %v694_v47 }
 0x3ef   : > { %v768_v55 = vpop.xlane.xlu0 %767  ;;  %v956_v7 = vunpack.c.l.b16 %v698_v2 }
 0x3f1   : > { %v1439_v46 = vpop.eup %1438 }
 0x3f2   : > { %v573_v62 = vmul.f32 %v1439_v46, %v560_v48  ;;  %v1441_v44 = vpop.eup %1440  ;;  %v685_v63 = vpop.f32.mrf.mxu2 }
 0x3f3   : > { %v695_v49 = vmul.f32 %v1441_v44, %v685_v63  ;;  %v1443_v10 = vpop.eup %1442  ;;  %v565_v52 = vpop.f32.mrf.mxu0 }
 0x3f4   : > { %v577_v0 = vpack.c.bf16 %v573_v62, %v573_v62  ;;  %v574_v12 = vmul.f32 %v1443_v10, %v563_v1  ;;  %v1309_v10 = vld [vmem:[#allocation9 + $0x8] sm:$0xff] }
 0x3f5   : > { %v699_v4 = vpack.c.bf16 %v695_v49, %v695_v49  ;;  %1072 = vmatpush.bf16.msra.mxu3 %v1309_v10 }
 0x3f6   : > { %v1984_v5 = vunpack.c.l.b16 %v577_v0  ;;  %v578_v14 = vpack.c.bf16 %v574_v12, %v574_v12 }
 0x3f7   : > { %v534_v6 = vpop.xlane.xlu0 %533  ;;  %v957_v8 = vunpack.c.l.b16 %v699_v4 }
 0x3f8   : > { %1444 = vrcp.f32 %v534_v6  ;;  %v948_v9 = vpack.c.b16 %v1984_v5, %v1982_v3  ;;  %v1989_v17 = vunpack.c.l.b16 %v578_v14 }
 0x3f9   : > { %v959_v11 = vpack.c.b16 %v957_v8, %v956_v7  ;;  %1446 = vrcp.f32 %v885_v38 }
 0x3fb   : > { %962 = vrot.lane.b32.xlu1 %v959_v11, %s1641_s28  ;;  %v918_v19 = vpop.f32.mrf.mxu2  ;;  %v1308_v11 = vld [vmem:[#allocation9] sm:$0xff] }
 0x3fc   : > { %1073 = vmatpush.bf16.msra.mxu3 %v1308_v11 }
 0x3fe   : > { %v1445_v13 = vpop.eup %1444 }
 0x3ff   : > { %v575_v15 = vmul.f32 %v1445_v13, %v565_v52  ;;  %v1447_v21 = vpop.eup %1446 }
 0x400   : > { %v932_v59 = vmul.f32 %v1447_v21, %v918_v19 }
 0x401   : > { %v579_v16 = vpack.c.bf16 %v575_v15, %v575_v15 }
 0x402   : > { %v936_v25 = vpack.c.bf16 %v932_v59, %v932_v59 }
 0x403   : > { %v1991_v57 = vunpack.c.l.b16 %v579_v16  ;;  %v920_v24 = vpop.f32.mrf.mxu2 }
 0x404   : > { %v982_v28 = vunpack.c.l.b16 %v936_v25 }
 0x405   : > { %v949_v56 = vpack.c.b16 %v1991_v57, %v1989_v17  ;;  %v1397_v17 = vld [vmem:[%s2060_s3] ss:$0 sm:$0xff] }
 0x420   : > { %v765_v18 = vpop.xlane.xlu2 %764 }
 0x421   : > { %1448 = vrcp.f32 %v765_v18 }
 0x427   : > { %v1449_v23 = vpop.eup %1448 }
 0x428   : > { %v888_v20 = vpop.xlane.xlu2 %887 }
 0x429   : > { %1450 = vrcp.f32 %v888_v20  ;;  %v891_v38 = vpop.xlane.xlu1 %890 }
 0x42a   : > { %1452 = vrcp.f32 %v768_v55 }
 0x42b   : > { %v798_v22 = vpop.f32.mrf.mxu0  ;;  %1454 = vrcp.f32 %v891_v38 }
 0x42c   : > { %v812_v26 = vmul.f32 %v1449_v23, %v798_v22 }
 0x42e   : > { %v816_v35 = vpack.c.bf16 %v812_v26, %v812_v26 }
 0x42f   : > { %v1451_v60 = vpop.eup %1450 }
 0x430   : > { %v933_v27 = vmul.f32 %v1451_v60, %v920_v24  ;;  %v1453_v33 = vpop.eup %1452  ;;  %v968_v41 = vunpack.c.l.b16 %v816_v35  ;;  %v774_v40 = vpop.xlane.xlu0 %773 }
 0x431   : > { %v1455_v50 = vpop.eup %1454 }
 0x432   : > { %v771_v29 = vpop.xlane.xlu2 %770  ;;  %v937_v31 = vpack.c.bf16 %v933_v27, %v933_v27 }
 0x433   : > { %v800_v34 = vpop.f32.mrf.mxu0  ;;  %1456 = vrcp.f32 %v771_v29 }
 0x434   : > { %v813_v30 = vmul.f32 %v1453_v33, %v800_v34  ;;  %v983_v36 = vunpack.c.l.b16 %v937_v31 }
 0x436   : > { %v817_v39 = vpack.c.bf16 %v813_v30, %v813_v30  ;;  %v986_v32 = vpack.c.b16 %v983_v36, %v982_v28 }
 0x438   : > { %v969_v42 = vunpack.c.l.b16 %v817_v39  ;;  %988 = vrot.lane.b32.xlu0 %v986_v32, %s1642_s29 }
 0x439   : > { %v1457_v53 = vpop.eup %1456 }
 0x43a   : > { %v972_v43 = vpack.c.b16 %v969_v42, %v968_v41  ;;  %v923_v37 = vpop.f32.mrf.mxu2  ;;  %v894_v45 = vpop.xlane.xlu2 %893 }
 0x43b   : > { %1458 = vrcp.f32 %v894_v45  ;;  %v934_v51 = vmul.f32 %v1455_v50, %v923_v37 }
 0x43c   : > { %974 = vrot.lane.b32.xlu2 %v972_v43, %s1643_s11  ;;  %1460 = vrcp.f32 %v774_v40 }
 0x43d   : > { %v803_v48 = vpop.f32.mrf.mxu0  ;;  %v938_v46 = vpack.c.bf16 %v934_v51, %v934_v51 }
 0x43e   : > { %v814_v55 = vmul.f32 %v1457_v53, %v803_v48 }
 0x43f   : > { %v984_v1 = vunpack.c.l.b16 %v938_v46 }
 0x440   : > { %v818_v63 = vpack.c.bf16 %v814_v55, %v814_v55 }
 0x441   : > { %v1459_v54 = vpop.eup %1458 }
 0x442   : > { %v925_v47 = vpop.f32.mrf.mxu2  ;;  %v1461_v61 = vpop.eup %1460  ;;  %v970_v6 = vunpack.c.l.b16 %v818_v63 }
 0x443   : > { %v935_v58 = vmul.f32 %v1459_v54, %v925_v47 }
 0x445   : > { %v939_v62 = vpack.c.bf16 %v935_v58, %v935_v58  ;;  %v805_v44 = vpop.f32.mrf.mxu0 }
 0x446   : > { %v815_v0 = vmul.f32 %v1461_v61, %v805_v44 }
 0x447   : > { %v985_v2 = vunpack.c.l.b16 %v939_v62 }
 0x448   : > { %v819_v49 = vpack.c.bf16 %v815_v0, %v815_v0 }
 0x449   : > { %v987_v4 = vpack.c.b16 %v985_v2, %v984_v1 }
 0x44a   : > { %v971_v7 = vunpack.c.l.b16 %v819_v49 }
 0x44b   : > { %990 = vrot.lane.b32.xlu2 %v987_v4, %s1642_s29 }
 0x44c   : > { %v973_v8 = vpack.c.b16 %v971_v7, %v970_v6 }
 0x44e   : > { %976 = vrot.lane.b32.xlu0 %v973_v8, %s1643_s11  ;;  %s1572_s11 = scalar_lea.hbm %s2061_s4, 64 }
 0x44f   : > { %p1574_p2 = scmp.lt.s32.totalorder %s1572_s11, %s1568_s19 }
 0x451   : > { %p1575_p9 = por %p1574_p2, %p1573_p11 }
 0x453   : > { %p1576_p10 = pnand %p1575_p9, %p1571_p8 }
 0x45d   : > { %v961_v12 = vpop.permute.xlu1 %960 }
 0x45e   : > { %v994_v52 = vsel %vm467_vm4, %v948_v9, %v961_v12 }
 0x46d   : > { %v963_v3 = vpop.permute.xlu1 %962 }
 0x46e   : > { %v997_v5 = vsel %vm467_vm4, %v949_v56, %v963_v3 }
 0x496   : > { %v975_v13 = vpop.permute.xlu2 %974 }
 0x497   : > { %v1000_v14 = vsel %vm998_vm6, %v994_v52, %v975_v13 }
 0x4a5   : > { %v991_v59 = vpop.permute.xlu2 %990 }
 0x4aa   : > { %v989_v15 = vpop.permute.xlu0 %988 }
 0x4ab   : > { %v1005_v16 = vsel %vm1003_vm7, %v1000_v14, %v989_v15 }
 0x4ac   : > { %v1010_v18 = vunpack.c.l.b16 %v1005_v16  ;;  %v1011_v19 = vunpack.c.h.b16 %v1005_v16 }
 0x4ae   : > { %v1014_v20 = vpack.c.b16 %v1010_v18, %v1010_v18  ;;  %v1015_v21 = vpack.c.b16 %v1011_v19, %v1011_v19 }
 0x4b0   : > { %1022 = vst.msk [vmem:[#allocation3] sm:$0xf] %vm312_vm1, %v1014_v20 }
 0x4b1   : > { %1023 = vst.msk [vmem:[#allocation3 + $0x4] sm:$0xf] %vm312_vm1, %v1015_v21 }
 0x4b8   : > { %v1306_v22 = vld [vmem:[#allocation3] sm:$0xff] }
 0x4b9   : > { %1288 = vmatmul.msk.bf16.vlgmr.msra.gmra.mxu3 %vm282_vm0, %v1306_v22 }
 0x4c0   : > { %v977_v9 = vpop.permute.xlu0 %976 }
 0x4c1   : > { %v1002_v23 = vsel %vm998_vm6, %v997_v5, %v977_v9 }
 0x4c2   : > { %v1007_v60 = vsel %vm1003_vm7, %v1002_v23, %v991_v59 }
 0x4c3   : > { %v1012_v24 = vunpack.c.l.b16 %v1007_v60  ;;  %v1013_v25 = vunpack.c.h.b16 %v1007_v60 }
 0x4c5   : > { %v1016_v26 = vpack.c.b16 %v1012_v24, %v1012_v24  ;;  %v1017_v27 = vpack.c.b16 %v1013_v25, %v1013_v25 }
 0x4c7   : > { %1024 = vst.msk [vmem:[#allocation3 + $0x8] sm:$0xf] %vm312_vm1, %v1016_v26 }
 0x4c8   : > { %1025 = vst.msk [vmem:[#allocation3 + $0xc] sm:$0xf] %vm312_vm1, %v1017_v27 }
 0x4cf   : > { %v1307_v29 = vld [vmem:[#allocation3 + $0x8] sm:$0xff] }
 0x4d0   : > { %1289 = vmatmul.msk.bf16.gmra.mxu3 %vm282_vm0, %v1307_v29 }
 0x53c   : > { %v1075_v57 = vpop.f32.mrf.mxu3 }
 0x53d   : > { %v1076_v56 = vadd.f32 %v1397_v17, %v1075_v57 }
 0x53f   : > { %1085 = vst.msk [vmem:[%s250_s21] sm:$0xff] %vm282_vm0, %v1076_v56 }
 0x544   : > { %v1077_v31 = vpop.f32.mrf.mxu3 }
 0x545   : > { %v1078_v33 = vadd.f32 %v1397_v17, %v1077_v31 }
 0x547   : > { %1086 = vst.msk [vmem:[%s250_s21 + $0x8] sm:$0xff] %vm282_vm0, %v1078_v33 }
 0x553   : > { %v1080_v34 = vpop.f32.mrf.mxu3 }
 0x554   : > { %v1081_v28 = vadd.f32 %v1397_v17, %v1080_v34 }
 0x556   : > { %1087 = vst.msk [vmem:[%s250_s21 + $0x10] sm:$0xff] %vm282_vm0, %v1081_v28 }
 0x55b   : > { %v1082_v35 = vpop.f32.mrf.mxu3 }
 0x55c   : > { %v1083_v30 = vadd.f32 %v1397_v17, %v1082_v35 }
 0x55e   : > { %1088 = vst.msk [vmem:[%s250_s21 + $0x18] sm:$0xff] %vm282_vm0, %v1083_v30 }
 0x55f   : > { %1579 = shalt.err (!%p1576_p10)
}
 0x560   : > { %s1644_s20 = smov 128  }
 0x561   : > { %1321 = dma.vmem_to_hbm [thread:$0]  (%p1742_p3), %s1103_s9, 512, %s1105_s24, %s1090_s23, %s1644_s20, %s1644_s20, %s1641_s28  }
 0x562 PF: > { %s1119_s6 = sand.u32 1, %s1610_s15   ;;  %p2067_p12 = scmp.ge.s32.totalorder %s1622_s18, 2 }
 0x563   : > { %s1120_s21 = scalar_lea.sflag [#allocation6], %s1119_s6 }
 0x564   : > { %p1335_p13 = pnand %p2067_p12, %p1705_p6 }
 0x566   : > { %p1336_p0 = pneg %p1335_p13 }
 0x568   : > { %1605 = dma.done.wait (%p1336_p0), %s1120_s21, 512  }
 0x569   : > { %1607 = vsyncadd (%p1336_p0), %s1120_s21, 4294966784  ;;  %p18_p5 = scmp.ge.s32.totalorder %s1732_s10, 4   ;;  %s2068_s15 = smov %s1614_s16 }
 0x56a   : > { %s2069_s16 = smov %s1618_s17  ;;  %s2070_s17 = smov %s1748_s14 }
 0x56b   : > { %s2071_s18 = smov %s1732_s10  ;;  %20 = sbr.rel (!%p18_p5) target bundleno = 6 (0x6), region = 89 }
 0x570   :  { %1126 = vsyncpa [#allocation5], 1 }
 0x571   :  { %1128 = vsyncpa [#allocation5 + $0x1], 1 }
 0x572   :  { %1129 = vsyncpa [#allocation8], 1 }
 0x573   :  { %1130 = vsyncpa [#allocation6], 1 }
 0x574   :  { %1132 = vsyncpa [#allocation6 + $0x1], 1 }

</bundles_post_ra>
